<compile_context>
chip_gen: v7x
topology: tpu7x:2x2x1
jax: 0.10.0
libtpu: 0.0.40
codegen_flags: <defaults>
</compile_context>

<pallas_src>
import functools
import math

import jax
import jax.numpy as jnp
from jax import lax
from jax.experimental import pallas as pl
from jax.experimental.pallas import tpu as pltpu

# ----------------------- configuration (mirrors __init__) -----------------------
RADIUS = 1.0
RESOLUTION = 16
N_SIGMA_COMP = (4, 4, 4)       # equal per-plane component counts (demo config)
N_RGB_COMP = (4, 4, 4)
SH_DEG = 2
SH_DIM = (SH_DEG + 1) ** 2     # 9
DATA_DIM = SH_DIM * 3          # 27
ABS_LIGHT_THRESH = 1e-4
STEP_RATIO = 0.5


def _update_stepsize(radius, resolution, step_ratio):
    diameter = radius * 2
    units = diameter / (resolution - 1)
    step_size = units * step_ratio
    grid_diag = math.sqrt(3 * diameter ** 2)
    n_samples = int(grid_diag / step_size) + 1
    return step_size, n_samples


STEP_SIZE, N_SAMPLES = _update_stepsize(RADIUS, RESOLUTION, STEP_RATIO)
NS = N_SAMPLES - 1             # 51 marching steps per ray


# --------------------------- reference math (plain JAX, f32) ---------------------------
def sh_basis_deg2(d):
    x, y, z = d[:, 0], d[:, 1], d[:, 2]
    return jnp.stack([
        0.28209479177387814 * jnp.ones_like(x),
        -0.4886025119029199 * y,
        0.4886025119029199 * z,
        -0.4886025119029199 * x,
        1.0925484305920792 * x * y,
        -1.0925484305920792 * y * z,
        0.31539156525252005 * (2.0 * z * z - x * x - y * y),
        -1.0925484305920792 * x * z,
        0.5462742152960396 * (x * x - y * y),
    ], axis=-1)


def _feature_math_ref(pts, sh, dplane, dline, rplane, rline, basis_wt, R):
    """Dense-tent grid_sample reference. pts: (N,3) normalized; sh: (N,SH_DIM)."""
    ix = (pts[:, 0:1] + 1.0) * 0.5 * (R - 1)
    iy = (pts[:, 1:2] + 1.0) * 0.5 * (R - 1)
    iz = (pts[:, 2:3] + 1.0) * 0.5 * (R - 1)

    iota1 = lax.broadcasted_iota(jnp.float32, (1, R), 1)
    iota2 = lax.broadcasted_iota(jnp.float32, (1, R * R), 1)
    kh = jnp.floor(iota2 / R)          # flat index -> row (H)
    kw = iota2 - kh * R                # flat index -> col (W)

    def tent(coord, grid_idx):         # align_corners=True bilinear weights (zeros padding)
        return jnp.maximum(1.0 - jnp.abs(coord - grid_idx), 0.0)

    def plane_w(h_coord, w_coord):     # (N, R*R) dense bilinear weight map
        return tent(h_coord, kh) * tent(w_coord, kw)

    # matches get_coordinate_plane: (x,y)=(p0,p1), (p0,p2), (p1,p2); x->W, y->H
    pw = [plane_w(iy, ix), plane_w(iz, ix), plane_w(iz, iy)]
    # matches get_coordinate_line: line coords z, y, x (sampled along H; W==1)
    lw = [tent(iz, iota1), tent(iy, iota1), tent(ix, iota1)]

    sigma = jnp.zeros((pts.shape[0], 1), jnp.float32)
    rgb_pf, rgb_lf = [], []
    for p in range(3):
        dpl = jnp.dot(pw[p], dplane[p], preferred_element_type=jnp.float32)
        dln = jnp.dot(lw[p], dline[p], preferred_element_type=jnp.float32)
        sigma = sigma + jnp.sum(dpl * dln, axis=-1, keepdims=True)
        rgb_pf.append(jnp.dot(pw[p], rplane[p], preferred_element_type=jnp.float32))
        rgb_lf.append(jnp.dot(lw[p], rline[p], preferred_element_type=jnp.float32))

    prod = jnp.concatenate([rgb_pf[p] * rgb_lf[p] for p in range(3)], axis=-1)
    feat = jnp.dot(prod, basis_wt, preferred_element_type=jnp.float32)     # (N, DATA_DIM)
    cols = [jnp.sum(sh * feat[:, c * SH_DIM:(c + 1) * SH_DIM], axis=-1, keepdims=True)
            for c in range(3)]
    rgb = jnp.concatenate(cols, axis=-1)                                   # (N, 3)
    return sigma, rgb


def reference_forward(params, rays_o, rays_d):
    """Faithful f32 forward (module semantics) used for the self-check."""
    dplane, dline, rplane, rline, basis_wt = params
    b = rays_o.shape[0]
    # sample_proposal (eval mode)
    vec = jnp.where(rays_d == 0, jnp.full_like(rays_d, 1e-6), rays_d)
    rate_a = (RADIUS - rays_o) / vec
    rate_b = (-RADIUS - rays_o) / vec
    t_min = jnp.minimum(rate_a, rate_b).max(axis=-1)
    rng = jnp.arange(N_SAMPLES, dtype=jnp.float32)[None]
    interpx = t_min[:, None] + STEP_SIZE * rng                             # (B, N_SAMPLES)
    zvals = interpx[:, :-1]                                                # (B, NS)
    pts = rays_o[:, None, :] + rays_d[:, None, :] * zvals[..., None]       # (B, NS, 3) world
    inbox = jnp.all((pts >= -RADIUS) & (pts <= RADIUS), axis=-1)           # module's mask
    pn = (pts + RADIUS) * (1.0 / (2 * RADIUS)) - 1.0                       # normalize_coord
    sh = sh_basis_deg2(rays_d)                                             # (B, 9)
    sh_s = jnp.broadcast_to(sh[:, None, :], (b, NS, SH_DIM)).reshape(-1, SH_DIM)

    sigma_feat, rgb_raw = _feature_math_ref(pn.reshape(-1, 3), sh_s, dplane, dline,
                                            rplane, rline, basis_wt, RESOLUTION)
    sigma = jnp.where(inbox, jnp.maximum(sigma_feat[:, 0].reshape(b, NS), 0.0), 0.0)
    rgb3 = rgb_raw.reshape(b, NS, 3)

    dnorm = jnp.sqrt(jnp.sum(rays_d * rays_d, axis=-1, keepdims=True))     # (B, 1)
    alpha = 1.0 - jnp.exp(-sigma * (STEP_SIZE * dnorm))
    trans = jnp.concatenate(
        [jnp.ones((b, 1), jnp.float32), jnp.cumprod(1.0 - alpha, axis=-1)[:, :-1]], axis=-1)
    weight = alpha * trans
    acc = jnp.sum(weight, axis=-1, keepdims=True)
    keep = (weight > ABS_LIGHT_THRESH)[..., None]
    rc = jnp.clip(jnp.where(keep, rgb3, 0.0) + 0.5, 0.0, 1.0)
    rgb_map = jnp.sum(weight[..., None] * rc, axis=1) + (1.0 - acc)        # white bg
    rgb_map = jnp.clip(rgb_map, 0.0, 1.0)
    depth = jnp.sum(weight * zvals, axis=-1)
    return rgb_map, depth


# --------------------------------- parameter packing ---------------------------------
def prepare_kernel_params(params):
    """Pack the VM decomposition into the two fused bf16 matmul operands (tiny JAX ops)."""
    dplane, dline, rplane, rline, basis_wt = params
    cd = dplane.shape[2]
    cr = rplane.shape[2]
    R = dline.shape[1]
    C = cd + cr
    dd = basis_wt.shape[1]                                                 # DATA_DIM
    RC = R * C

    # PT[p, w*C+c, h] = plane_p[h, w, c]   (density comps first, then rgb comps)
    pcomb = jnp.concatenate([dplane.reshape(3, R, R, cd),
                             rplane.reshape(3, R, R, cr)], axis=-1)        # (3, H, W, C)
    PT = pcomb.transpose(0, 2, 3, 1).reshape(3, RC, R)
    # LT[p, w*C+c, h] = line_p[h, c]
    lcomb = jnp.concatenate([dline, rline], axis=-1)                       # (3, H, C)
    LT = jnp.tile(lcomb.transpose(0, 2, 1), (1, R, 1))                     # (3, RC, R)

    # Single block-structured LHS for all six plane/line H-tent matmuls.
    # Column blocks: 0:R -> tent_x, R:2R -> tent_y, 2R:3R -> tent_z.
    # Row blocks   : [m0 m1 m2 | lr0 lr1 lr2], each RC tall.
    zero = jnp.zeros((RC, R), jnp.float32)
    w_rows = [
        jnp.concatenate([zero, PT[0], zero], axis=1),   # m0  = P0 @ tent_y
        jnp.concatenate([zero, zero, PT[1]], axis=1),   # m1  = P1 @ tent_z
        jnp.concatenate([zero, zero, PT[2]], axis=1),   # m2  = P2 @ tent_z
        jnp.concatenate([zero, zero, LT[0]], axis=1),   # lr0 = L0 @ tent_z
        jnp.concatenate([zero, LT[1], zero], axis=1),   # lr1 = L1 @ tent_y
        jnp.concatenate([LT[2], zero, zero], axis=1),   # lr2 = L2 @ tent_x
    ]
    W = jnp.concatenate(w_rows, axis=0)                                    # (6*RC, 3*R)

    # Fused projection: e (3*RC, N) -> [sigma_raw ; DATA_DIM SH features]
    fts = []
    for p in range(3):
        small = jnp.zeros((C, 1 + dd), jnp.float32)
        small = small.at[:cd, 0].set(1.0)                                  # density -> sigma
        small = small.at[cd:, 1:].set(basis_wt[p * cr:(p + 1) * cr, :])    # rgb -> basis
        fts.append(jnp.tile(small, (R, 1)).T)                              # (1+dd, RC)
    FT = jnp.concatenate(fts, axis=1)                                      # (1+dd, 3*RC)

    return W.astype(jnp.bfloat16), FT.astype(jnp.bfloat16), R, C


# --------------------------------- the fused Pallas kernel ---------------------------------
def _ray_march_kernel(o_ref, d_ref, w_ref, ft_ref, out_ref, *,
                      radius, res, comp, n_steps, step, thresh):
    R, C = res, comp
    RC3 = 3 * R * C
    o = o_ref[...]                         # (3, tb) world ray origins
    d = d_ref[...]                         # (3, tb) ray directions
    wmat = w_ref[...]                      # (6*R*C, 3*R)   bf16 fused plane/line LHS
    fmat = ft_ref[...]                     # (1+27, 3*R*C)  bf16 fused projection
    tb = o.shape[1]

    # --- per-ray setup (sample_proposal entry point, eval mode) ---
    vec = jnp.where(d == 0.0, jnp.float32(1e-6), d)
    rate_a = (radius - o) / vec
    rate_b = (-radius - o) / vec
    t_min = jnp.max(jnp.minimum(rate_a, rate_b), axis=0, keepdims=True)    # (1, tb)

    dnorm = jnp.sqrt(jnp.sum(d * d, axis=0, keepdims=True))                # (1, tb)
    sdn = jnp.float32(step) * dnorm                                        # dist * |d|

    # real SH deg-2 basis per ray  (sh_encoder is external in the repo)
    x, y, z = d[0:1, :], d[1:2, :], d[2:3, :]
    sh9 = jnp.concatenate([
        0.28209479177387814 * jnp.ones_like(x),
        -0.4886025119029199 * y,
        0.4886025119029199 * z,
        -0.4886025119029199 * x,
        1.0925484305920792 * x * y,
        -1.0925484305920792 * y * z,
        0.31539156525252005 * (2.0 * z * z - x * x - y * y),
        -1.0925484305920792 * x * z,
        0.5462742152960396 * (x * x - y * y),
    ], axis=0)                                                             # (9, tb)

    iota_h = lax.broadcasted_iota(jnp.int32, (R, 1), 0).astype(jnp.float32)
    scale = 0.5 * (R - 1)
    inv2r = 1.0 / (2.0 * radius)

    def body(s, carry):
        trans, acc, rgb_acc, depth_acc = carry
        zs = t_min + jnp.float32(step) * s.astype(jnp.float32)             # (1, tb)
        pts = o + d * zs                                                   # (3, tb) world
        # module's in-box mask: world pts within [-radius, radius] on every axis
        inbox = ((pts[0:1, :] >= -radius) & (pts[0:1, :] <= radius) &
                 (pts[1:2, :] >= -radius) & (pts[1:2, :] <= radius) &
                 (pts[2:3, :] >= -radius) & (pts[2:3, :] <= radius))
        pn = (pts + radius) * inv2r - 1.0                                  # normalize_coord
        g = (pn + 1.0) * scale                                             # grid coords

        def tent(gc):                                                      # (1,tb) -> (R,tb)
            return jnp.maximum(1.0 - jnp.abs(gc - iota_h), 0.0)

        tx, ty, tz = tent(g[0:1, :]), tent(g[1:2, :]), tent(g[2:3, :])     # (R, tb) f32
        t48 = jnp.concatenate([tx, ty, tz], axis=0).astype(jnp.bfloat16)   # (3R, tb)

        # one MXU matmul for all six plane/line H-interpolations
        ml = jnp.dot(wmat, t48, preferred_element_type=jnp.float32)        # (6RC, tb) f32

        # W-direction tents: (R, tb) replicated C times along sublanes (no dense VALU tent)
        tw = jnp.concatenate([tx, tx, ty], axis=0)                         # (3R, tb)
        twd = jnp.broadcast_to(tw[:, None, :], (3 * R, C, tb)).reshape(RC3, tb)

        e = ml[:RC3, :] * twd * ml[RC3:, :]                                # (3RC, tb) f32
        feat = jnp.dot(fmat, e.astype(jnp.bfloat16),
                       preferred_element_type=jnp.float32)                 # (28, tb) f32

        sigma = jnp.where(inbox, jnp.maximum(feat[0:1, :], 0.0), 0.0)      # ReLU + mask
        rgb = jnp.concatenate(
            [jnp.sum(feat[1 + c * SH_DIM:1 + (c + 1) * SH_DIM, :] * sh9,
                     axis=0, keepdims=True) for c in range(3)], axis=0)    # (3, tb)

        # online volume rendering (exclusive transmittance product)
        alpha = 1.0 - jnp.exp(-sigma * sdn)
        wgt = alpha * trans
        keep = wgt > thresh
        rc = jnp.clip(jnp.where(keep, rgb, 0.0) + 0.5, 0.0, 1.0)           # shrgb2rgb
        return (trans * (1.0 - alpha),
                acc + wgt,
                rgb_acc + wgt * rc,
                depth_acc + wgt * zs)

    init = (jnp.ones((1, tb), jnp.float32),
            jnp.zeros((1, tb), jnp.float32),
            jnp.zeros((3, tb), jnp.float32),
            jnp.zeros((1, tb), jnp.float32))
    trans, acc, rgb_acc, depth_acc = lax.fori_loop(0, n_steps, body, init)

    rgb_map = jnp.clip(rgb_acc + (1.0 - acc), 0.0, 1.0)                    # white background
    out_ref[...] = jnp.concatenate([rgb_map, depth_acc], axis=0)           # (4, tb) lane-dense


# --------------------------------- wrapper ---------------------------------
def tensor_rf_forward(params, rays_o, rays_d, *, tile_b=1024):
    """rays_o/rays_d: (B, 3) world-space rays.  Returns rgb_map (B, 3), depth (B,)."""
    W_bf, FT_bf, R, C = prepare_kernel_params(params)
    b = rays_o.shape[0]
    tile_b = min(tile_b, pl.cdiv(b, 128) * 128)          # lane-dense ray tiles
    b_pad = pl.cdiv(b, tile_b) * tile_b

    o_cm = jnp.pad(rays_o, ((0, b_pad - b), (0, 0))).T   # (3, b_pad) channel-major
    d_cm = jnp.pad(rays_d, ((0, b_pad - b), (0, 0))).T   # padded rays render to (1,1,1,0)

    kernel = functools.partial(_ray_march_kernel, radius=RADIUS, res=R, comp=C,
                               n_steps=NS, step=STEP_SIZE, thresh=ABS_LIGHT_THRESH)
    out = pl.pallas_call(
        kernel,
        out_shape=jax.ShapeDtypeStruct((4, b_pad), jnp.float32),
        grid=(b_pad // tile_b,),
        in_specs=[
            pl.BlockSpec((3, tile_b), lambda i: (0, i)),
            pl.BlockSpec((3, tile_b), lambda i: (0, i)),
            pl.BlockSpec(W_bf.shape, lambda i: (0, 0)),
            pl.BlockSpec(FT_bf.shape, lambda i: (0, 0)),
        ],
        out_specs=pl.BlockSpec((4, tile_b), lambda i: (0, i)),
        compiler_params=pltpu.CompilerParams(
            dimension_semantics=("parallel",),
            vmem_limit_bytes=48 * 1024 * 1024),          # <= v7x 64 MiB/TC with headroom
    )(o_cm, d_cm, W_bf, FT_bf)

    rgb_map = out[:3, :b].T                              # (B, 3)
    depth = out[3, :b]                                   # (B,)
    return rgb_map, depth


# --------------------------------- parameter init ---------------------------------
def init_params(key):
    ks = jax.random.split(key, 5)
    R, cd, cr = RESOLUTION, N_SIGMA_COMP[0], N_RGB_COMP[0]
    dplane = 0.1 * jax.random.normal(ks[0], (3, cd, R, R), jnp.float32)
    dline = 0.1 * jax.random.normal(ks[1], (3, cd, R, 1), jnp.float32)
    rplane = 0.1 * jax.random.normal(ks[2], (3, cr, R, R), jnp.float32)
    rline = 0.1 * jax.random.normal(ks[3], (3, cr, R, 1), jnp.float32)
    sum_cr = sum(N_RGB_COMP)
    bound = 1.0 / math.sqrt(sum_cr)
    basis_w = jax.random.uniform(ks[4], (DATA_DIM, sum_cr), jnp.float32, -bound, bound)
    # convert NCHW parameters into the canonical (plane, H*W, C) / (plane, H, C) layout
    dplane_m = dplane.transpose(0, 2, 3, 1).reshape(3, R * R, cd)
    dline_m = dline[:, :, :, 0].transpose(0, 2, 1)
    rplane_m = rplane.transpose(0, 2, 3, 1).reshape(3, R * R, cr)
    rline_m = rline[:, :, :, 0].transpose(0, 2, 1)
    return dplane_m, dline_m, rplane_m, rline_m, basis_w.T


if __name__ == "__main__":
    key = jax.random.PRNGKey(0)
    kp, ko, kd = jax.random.split(key, 3)
    params = init_params(kp)

    B = 2
    rays_o = jax.random.uniform(ko, (B, 3), jnp.float32, -0.4, 0.4)
    rays_d = jax.random.normal(kd, (B, 3), jnp.float32)
    rays_d = rays_d / jnp.sqrt(jnp.sum(rays_d * rays_d, axis=-1, keepdims=True))

    fwd = jax.jit(tensor_rf_forward)
    rgb_map, depth = fwd(params, rays_o, rays_d)
    jax.block_until_ready((rgb_map, depth))

    rgb_ref, depth_ref = reference_forward(params, rays_o, rays_d)
    assert rgb_map.shape == (B, 3) and depth.shape == (B,)
    # Kernel feeds bf16 operands to the MXU (f32 accumulation); tolerance vs the f32
    # reference is relaxed accordingly (estimated worst-case drift << 5e-3).
    assert jnp.allclose(rgb_map, rgb_ref, atol=5e-3), (rgb_map, rgb_ref)
    assert jnp.allclose(depth, depth_ref, atol=5e-3), (depth, depth_ref)
    print("KERNEL_OK")
</pallas_src>

<mosaic_0001>
module attributes {stable_mosaic.version = 11 : i64} {
  func.func @_ray_march_kernel(%arg0: i32, %arg1: memref<3x128xf32, #tpu.memory_space<vmem>>, %arg2: memref<3x128xf32, #tpu.memory_space<vmem>>, %arg3: memref<768x48xbf16, #tpu.memory_space<vmem>>, %arg4: memref<28x384xbf16, #tpu.memory_space<vmem>>, %arg5: memref<4x128xf32, #tpu.memory_space<vmem>>) attributes {dimension_semantics = [#tpu.dimension_semantics<parallel>], iteration_bounds = array<i64: 1>, scalar_prefetch = 0 : i64, scratch_operands = 0 : i64, tpu.core_type = #tpu.core_type<tc>, window_params = [{transform_indices = @transform_0, window_bounds = array<i64: 3, 128>}, {transform_indices = @transform_1, window_bounds = array<i64: 3, 128>}, {pipeline_mode = #tpu.pipeline_mode<synchronous>, transform_indices = @transform_2, window_bounds = array<i64: 768, 48>}, {pipeline_mode = #tpu.pipeline_mode<synchronous>, transform_indices = @transform_3, window_bounds = array<i64: 28, 384>}, {transform_indices = @transform_4, window_bounds = array<i64: 4, 128>}]} {
    %c0 = arith.constant 0 : index
    %c0_0 = arith.constant 0 : index
    %0 = vector.load %arg1[%c0, %c0_0] : memref<3x128xf32, #tpu.memory_space<vmem>>, vector<3x128xf32>
    %c0_1 = arith.constant 0 : index
    %c0_2 = arith.constant 0 : index
    %1 = vector.load %arg2[%c0_1, %c0_2] : memref<3x128xf32, #tpu.memory_space<vmem>>, vector<3x128xf32>
    %c0_3 = arith.constant 0 : index
    %c0_4 = arith.constant 0 : index
    %2 = vector.load %arg3[%c0_3, %c0_4] : memref<768x48xbf16, #tpu.memory_space<vmem>>, vector<768x48xbf16>
    %c0_5 = arith.constant 0 : index
    %c0_6 = arith.constant 0 : index
    %3 = vector.load %arg4[%c0_5, %c0_6] : memref<28x384xbf16, #tpu.memory_space<vmem>>, vector<28x384xbf16>
    %cst = arith.constant 0.000000e+00 : f32
    %4 = vector.broadcast %cst : f32 to vector<3x128xf32>
    %5 = arith.cmpf oeq, %1, %4 : vector<3x128xf32>
    %cst_7 = arith.constant 9.99999997E-7 : f32
    %6 = vector.broadcast %cst_7 : f32 to vector<3x128xf32>
    %7 = arith.select %5, %6, %1 : vector<3x128xi1>, vector<3x128xf32>
    %cst_8 = arith.constant 1.000000e+00 : f32
    %8 = vector.broadcast %cst_8 : f32 to vector<3x128xf32>
    %9 = arith.subf %8, %0 : vector<3x128xf32>
    %10 = arith.divf %9, %7 : vector<3x128xf32>
    %cst_9 = arith.constant -1.000000e+00 : f32
    %11 = vector.broadcast %cst_9 : f32 to vector<3x128xf32>
    %12 = arith.subf %11, %0 : vector<3x128xf32>
    %13 = arith.divf %12, %7 : vector<3x128xf32>
    %14 = arith.minimumf %10, %13 : vector<3x128xf32>
    %cst_10 = arith.constant dense<0xFF800000> : vector<128xf32>
    %15 = vector.multi_reduction <maximumf>, %14, %cst_10 [0] : vector<3x128xf32> to vector<128xf32>
    %16 = vector.shape_cast %15 : vector<128xf32> to vector<1x128xf32>
    %17 = arith.mulf %1, %1 : vector<3x128xf32>
    %cst_11 = arith.constant dense<0.000000e+00> : vector<128xf32>
    %18 = vector.multi_reduction <add>, %17, %cst_11 [0] : vector<3x128xf32> to vector<128xf32>
    %19 = vector.shape_cast %18 : vector<128xf32> to vector<1x128xf32>
    %20 = math.sqrt %19 : vector<1x128xf32>
    %cst_12 = arith.constant 0.0666666701 : f32
    %21 = vector.broadcast %cst_12 : f32 to vector<1x128xf32>
    %22 = arith.mulf %21, %20 : vector<1x128xf32>
    %23 = vector.extract_strided_slice %1 {offsets = [0, 0], sizes = [1, 128], strides = [1, 1]} : vector<3x128xf32> to vector<1x128xf32>
    %24 = vector.extract_strided_slice %1 {offsets = [1, 0], sizes = [1, 128], strides = [1, 1]} : vector<3x128xf32> to vector<1x128xf32>
    %25 = vector.extract_strided_slice %1 {offsets = [2, 0], sizes = [1, 128], strides = [1, 1]} : vector<3x128xf32> to vector<1x128xf32>
    %cst_13 = arith.constant 1.000000e+00 : f32
    %26 = vector.broadcast %cst_13 : f32 to vector<1x128xf32>
    %cst_14 = arith.constant 0.282094806 : f32
    %27 = vector.broadcast %cst_14 : f32 to vector<1x128xf32>
    %28 = arith.mulf %27, %26 : vector<1x128xf32>
    %cst_15 = arith.constant -0.488602519 : f32
    %29 = vector.broadcast %cst_15 : f32 to vector<1x128xf32>
    %30 = arith.mulf %29, %24 : vector<1x128xf32>
    %cst_16 = arith.constant 0.488602519 : f32
    %31 = vector.broadcast %cst_16 : f32 to vector<1x128xf32>
    %32 = arith.mulf %31, %25 : vector<1x128xf32>
    %cst_17 = arith.constant -0.488602519 : f32
    %33 = vector.broadcast %cst_17 : f32 to vector<1x128xf32>
    %34 = arith.mulf %33, %23 : vector<1x128xf32>
    %cst_18 = arith.constant 1.09254849 : f32
    %35 = vector.broadcast %cst_18 : f32 to vector<1x128xf32>
    %36 = arith.mulf %35, %23 : vector<1x128xf32>
    %37 = arith.mulf %36, %24 : vector<1x128xf32>
    %cst_19 = arith.constant -1.09254849 : f32
    %38 = vector.broadcast %cst_19 : f32 to vector<1x128xf32>
    %39 = arith.mulf %38, %24 : vector<1x128xf32>
    %40 = arith.mulf %39, %25 : vector<1x128xf32>
    %cst_20 = arith.constant 2.000000e+00 : f32
    %41 = vector.broadcast %cst_20 : f32 to vector<1x128xf32>
    %42 = arith.mulf %41, %25 : vector<1x128xf32>
    %43 = arith.mulf %42, %25 : vector<1x128xf32>
    %44 = arith.mulf %23, %23 : vector<1x128xf32>
    %45 = arith.subf %43, %44 : vector<1x128xf32>
    %46 = arith.mulf %24, %24 : vector<1x128xf32>
    %47 = arith.subf %45, %46 : vector<1x128xf32>
    %cst_21 = arith.constant 0.31539157 : f32
    %48 = vector.broadcast %cst_21 : f32 to vector<1x128xf32>
    %49 = arith.mulf %48, %47 : vector<1x128xf32>
    %cst_22 = arith.constant -1.09254849 : f32
    %50 = vector.broadcast %cst_22 : f32 to vector<1x128xf32>
    %51 = arith.mulf %50, %23 : vector<1x128xf32>
    %52 = arith.mulf %51, %25 : vector<1x128xf32>
    %53 = arith.mulf %23, %23 : vector<1x128xf32>
    %54 = arith.mulf %24, %24 : vector<1x128xf32>
    %55 = arith.subf %53, %54 : vector<1x128xf32>
    %cst_23 = arith.constant 0.546274245 : f32
    %56 = vector.broadcast %cst_23 : f32 to vector<1x128xf32>
    %57 = arith.mulf %56, %55 : vector<1x128xf32>
    %58 = tpu.concatenate %28, %30, %32, %34, %37, %40, %49, %52, %57 in 0 : vector<1x128xf32>, vector<1x128xf32>, vector<1x128xf32>, vector<1x128xf32>, vector<1x128xf32>, vector<1x128xf32>, vector<1x128xf32>, vector<1x128xf32>, vector<1x128xf32> -> vector<9x128xf32>
    %59 = tpu.iota {dimensions = array<i32: 0>} : vector<16x1xi32>
    %60 = arith.sitofp %59 : vector<16x1xi32> to vector<16x1xf32>
    %cst_24 = arith.constant 1.000000e+00 : f32
    %61 = vector.broadcast %cst_24 : f32 to vector<1x128xf32>
    %cst_25 = arith.constant 0.000000e+00 : f32
    %62 = vector.broadcast %cst_25 : f32 to vector<1x128xf32>
    %cst_26 = arith.constant 0.000000e+00 : f32
    %63 = vector.broadcast %cst_26 : f32 to vector<3x128xf32>
    %cst_27 = arith.constant 0.000000e+00 : f32
    %64 = vector.broadcast %cst_27 : f32 to vector<1x128xf32>
    %c0_i32 = arith.constant 0 : i32
    %c51_i32 = arith.constant 51 : i32
    %65 = arith.addi %c0_i32, %c51_i32 : i32
    %c1_i32 = arith.constant 1 : i32
    %66:4 = scf.for %arg6 = %c0_i32 to %65 step %c1_i32 iter_args(%arg7 = %61, %arg8 = %62, %arg9 = %63, %arg10 = %64) -> (vector<1x128xf32>, vector<1x128xf32>, vector<3x128xf32>, vector<1x128xf32>)  : i32 {
      %77 = arith.sitofp %arg6 : i32 to f32
      %cst_34 = arith.constant 0.0666666701 : f32
      %78 = arith.mulf %cst_34, %77 : f32
      %79 = vector.broadcast %78 : f32 to vector<1x128xf32>
      %80 = arith.addf %16, %79 : vector<1x128xf32>
      %81 = vector.broadcast %80 : vector<1x128xf32> to vector<3x128xf32>
      %82 = arith.mulf %1, %81 : vector<3x128xf32>
      %83 = arith.addf %0, %82 : vector<3x128xf32>
      %84 = vector.extract_strided_slice %83 {offsets = [0, 0], sizes = [1, 128], strides = [1, 1]} : vector<3x128xf32> to vector<1x128xf32>
      %cst_35 = arith.constant -1.000000e+00 : f32
      %85 = vector.broadcast %cst_35 : f32 to vector<1x128xf32>
      %86 = arith.cmpf oge, %84, %85 : vector<1x128xf32>
      %87 = vector.extract_strided_slice %83 {offsets = [0, 0], sizes = [1, 128], strides = [1, 1]} : vector<3x128xf32> to vector<1x128xf32>
      %cst_36 = arith.constant 1.000000e+00 : f32
      %88 = vector.broadcast %cst_36 : f32 to vector<1x128xf32>
      %89 = arith.cmpf ole, %87, %88 : vector<1x128xf32>
      %90 = arith.andi %86, %89 : vector<1x128xi1>
      %91 = vector.extract_strided_slice %83 {offsets = [1, 0], sizes = [1, 128], strides = [1, 1]} : vector<3x128xf32> to vector<1x128xf32>
      %cst_37 = arith.constant -1.000000e+00 : f32
      %92 = vector.broadcast %cst_37 : f32 to vector<1x128xf32>
      %93 = arith.cmpf oge, %91, %92 : vector<1x128xf32>
      %94 = arith.andi %90, %93 : vector<1x128xi1>
      %95 = vector.extract_strided_slice %83 {offsets = [1, 0], sizes = [1, 128], strides = [1, 1]} : vector<3x128xf32> to vector<1x128xf32>
      %cst_38 = arith.constant 1.000000e+00 : f32
      %96 = vector.broadcast %cst_38 : f32 to vector<1x128xf32>
      %97 = arith.cmpf ole, %95, %96 : vector<1x128xf32>
      %98 = arith.andi %94, %97 : vector<1x128xi1>
      %99 = vector.extract_strided_slice %83 {offsets = [2, 0], sizes = [1, 128], strides = [1, 1]} : vector<3x128xf32> to vector<1x128xf32>
      %cst_39 = arith.constant -1.000000e+00 : f32
      %100 = vector.broadcast %cst_39 : f32 to vector<1x128xf32>
      %101 = arith.cmpf oge, %99, %100 : vector<1x128xf32>
      %102 = arith.andi %98, %101 : vector<1x128xi1>
      %103 = vector.extract_strided_slice %83 {offsets = [2, 0], sizes = [1, 128], strides = [1, 1]} : vector<3x128xf32> to vector<1x128xf32>
      %cst_40 = arith.constant 1.000000e+00 : f32
      %104 = vector.broadcast %cst_40 : f32 to vector<1x128xf32>
      %105 = arith.cmpf ole, %103, %104 : vector<1x128xf32>
      %106 = arith.andi %102, %105 : vector<1x128xi1>
      %cst_41 = arith.constant 1.000000e+00 : f32
      %107 = vector.broadcast %cst_41 : f32 to vector<3x128xf32>
      %108 = arith.addf %83, %107 : vector<3x128xf32>
      %cst_42 = arith.constant 5.000000e-01 : f32
      %109 = vector.broadcast %cst_42 : f32 to vector<3x128xf32>
      %110 = arith.mulf %108, %109 : vector<3x128xf32>
      %cst_43 = arith.constant 1.000000e+00 : f32
      %111 = vector.broadcast %cst_43 : f32 to vector<3x128xf32>
      %112 = arith.subf %110, %111 : vector<3x128xf32>
      %cst_44 = arith.constant 1.000000e+00 : f32
      %113 = vector.broadcast %cst_44 : f32 to vector<3x128xf32>
      %114 = arith.addf %112, %113 : vector<3x128xf32>
      %cst_45 = arith.constant 7.500000e+00 : f32
      %115 = vector.broadcast %cst_45 : f32 to vector<3x128xf32>
      %116 = arith.mulf %114, %115 : vector<3x128xf32>
      %117 = vector.extract_strided_slice %116 {offsets = [0, 0], sizes = [1, 128], strides = [1, 1]} : vector<3x128xf32> to vector<1x128xf32>
      %118 = vector.broadcast %117 : vector<1x128xf32> to vector<16x128xf32>
      %119 = vector.broadcast %60 : vector<16x1xf32> to vector<16x128xf32>
      %120 = arith.subf %118, %119 : vector<16x128xf32>
      %121 = math.absf %120 : vector<16x128xf32>
      %cst_46 = arith.constant 1.000000e+00 : f32
      %122 = vector.broadcast %cst_46 : f32 to vector<16x128xf32>
      %123 = arith.subf %122, %121 : vector<16x128xf32>
      %cst_47 = arith.constant 0.000000e+00 : f32
      %124 = vector.broadcast %cst_47 : f32 to vector<16x128xf32>
      %125 = arith.maximumf %123, %124 : vector<16x128xf32>
      %126 = vector.extract_strided_slice %116 {offsets = [1, 0], sizes = [1, 128], strides = [1, 1]} : vector<3x128xf32> to vector<1x128xf32>
      %127 = vector.broadcast %126 : vector<1x128xf32> to vector<16x128xf32>
      %128 = vector.broadcast %60 : vector<16x1xf32> to vector<16x128xf32>
      %129 = arith.subf %127, %128 : vector<16x128xf32>
      %130 = math.absf %129 : vector<16x128xf32>
      %cst_48 = arith.constant 1.000000e+00 : f32
      %131 = vector.broadcast %cst_48 : f32 to vector<16x128xf32>
      %132 = arith.subf %131, %130 : vector<16x128xf32>
      %cst_49 = arith.constant 0.000000e+00 : f32
      %133 = vector.broadcast %cst_49 : f32 to vector<16x128xf32>
      %134 = arith.maximumf %132, %133 : vector<16x128xf32>
      %135 = vector.extract_strided_slice %116 {offsets = [2, 0], sizes = [1, 128], strides = [1, 1]} : vector<3x128xf32> to vector<1x128xf32>
      %136 = vector.broadcast %135 : vector<1x128xf32> to vector<16x128xf32>
      %137 = vector.broadcast %60 : vector<16x1xf32> to vector<16x128xf32>
      %138 = arith.subf %136, %137 : vector<16x128xf32>
      %139 = math.absf %138 : vector<16x128xf32>
      %cst_50 = arith.constant 1.000000e+00 : f32
      %140 = vector.broadcast %cst_50 : f32 to vector<16x128xf32>
      %141 = arith.subf %140, %139 : vector<16x128xf32>
      %cst_51 = arith.constant 0.000000e+00 : f32
      %142 = vector.broadcast %cst_51 : f32 to vector<16x128xf32>
      %143 = arith.maximumf %141, %142 : vector<16x128xf32>
      %144 = tpu.concatenate %125, %134, %143 in 0 : vector<16x128xf32>, vector<16x128xf32>, vector<16x128xf32> -> vector<48x128xf32>
      %145 = arith.truncf %144 : vector<48x128xf32> to vector<48x128xbf16>
      %cst_52 = arith.constant dense<0.000000e+00> : vector<768x128xf32>
      %146 = tpu.matmul %2, %145, %cst_52 {dimension_numbers = #tpu.dot_dimension_numbers<[1], [0], [0], [1], [0, 0, 1, 1], [], []>} : vector<768x48xbf16>, vector<48x128xbf16>, vector<768x128xf32> -> vector<768x128xf32>
      %147 = tpu.concatenate %125, %125, %134 in 0 : vector<16x128xf32>, vector<16x128xf32>, vector<16x128xf32> -> vector<48x128xf32>
      %148 = vector.shape_cast %147 : vector<48x128xf32> to vector<48x1x128xf32>
      %149 = vector.shape_cast %148 : vector<48x1x128xf32> to vector<48x1x128xf32>
      %150 = vector.broadcast %149 : vector<48x1x128xf32> to vector<48x8x128xf32>
      %151 = vector.shape_cast %150 : vector<48x8x128xf32> to vector<384x128xf32>
      %152 = vector.extract_strided_slice %146 {offsets = [0, 0], sizes = [384, 128], strides = [1, 1]} : vector<768x128xf32> to vector<384x128xf32>
      %153 = arith.mulf %152, %151 : vector<384x128xf32>
      %154 = vector.extract_strided_slice %146 {offsets = [384, 0], sizes = [384, 128], strides = [1, 1]} : vector<768x128xf32> to vector<384x128xf32>
      %155 = arith.mulf %153, %154 : vector<384x128xf32>
      %156 = arith.truncf %155 : vector<384x128xf32> to vector<384x128xbf16>
      %cst_53 = arith.constant dense<0.000000e+00> : vector<28x128xf32>
      %157 = tpu.matmul %3, %156, %cst_53 {dimension_numbers = #tpu.dot_dimension_numbers<[1], [0], [0], [1], [0, 0, 1, 1], [], []>} : vector<28x384xbf16>, vector<384x128xbf16>, vector<28x128xf32> -> vector<28x128xf32>
      %158 = vector.extract_strided_slice %157 {offsets = [0, 0], sizes = [1, 128], strides = [1, 1]} : vector<28x128xf32> to vector<1x128xf32>
      %cst_54 = arith.constant 0.000000e+00 : f32
      %159 = vector.broadcast %cst_54 : f32 to vector<1x128xf32>
      %160 = arith.maximumf %158, %159 : vector<1x128xf32>
      %cst_55 = arith.constant 0.000000e+00 : f32
      %161 = vector.broadcast %cst_55 : f32 to vector<1x128xf32>
      %162 = arith.select %106, %160, %161 : vector<1x128xi1>, vector<1x128xf32>
      %163 = vector.extract_strided_slice %157 {offsets = [1, 0], sizes = [9, 128], strides = [1, 1]} : vector<28x128xf32> to vector<9x128xf32>
      %164 = arith.mulf %163, %58 : vector<9x128xf32>
      %cst_56 = arith.constant dense<0.000000e+00> : vector<128xf32>
      %165 = vector.multi_reduction <add>, %164, %cst_56 [0] : vector<9x128xf32> to vector<128xf32>
      %166 = vector.shape_cast %165 : vector<128xf32> to vector<1x128xf32>
      %167 = vector.extract_strided_slice %157 {offsets = [10, 0], sizes = [9, 128], strides = [1, 1]} : vector<28x128xf32> to vector<9x128xf32>
      %168 = arith.mulf %167, %58 : vector<9x128xf32>
      %cst_57 = arith.constant dense<0.000000e+00> : vector<128xf32>
      %169 = vector.multi_reduction <add>, %168, %cst_57 [0] : vector<9x128xf32> to vector<128xf32>
      %170 = vector.shape_cast %169 : vector<128xf32> to vector<1x128xf32>
      %171 = vector.extract_strided_slice %157 {offsets = [19, 0], sizes = [9, 128], strides = [1, 1]} : vector<28x128xf32> to vector<9x128xf32>
      %172 = arith.mulf %171, %58 : vector<9x128xf32>
      %cst_58 = arith.constant dense<0.000000e+00> : vector<128xf32>
      %173 = vector.multi_reduction <add>, %172, %cst_58 [0] : vector<9x128xf32> to vector<128xf32>
      %174 = vector.shape_cast %173 : vector<128xf32> to vector<1x128xf32>
      %175 = tpu.concatenate %166, %170, %174 in 0 : vector<1x128xf32>, vector<1x128xf32>, vector<1x128xf32> -> vector<3x128xf32>
      %cst_59 = arith.constant 0.000000e+00 : f32
      %176 = vector.broadcast %cst_59 : f32 to vector<1x128xf32>
      %177 = arith.subf %176, %162 : vector<1x128xf32>
      %178 = arith.mulf %177, %22 : vector<1x128xf32>
      %179 = math.exp %178 : vector<1x128xf32>
      %cst_60 = arith.constant 1.000000e+00 : f32
      %180 = vector.broadcast %cst_60 : f32 to vector<1x128xf32>
      %181 = arith.subf %180, %179 : vector<1x128xf32>
      %182 = arith.mulf %181, %arg7 : vector<1x128xf32>
      %cst_61 = arith.constant 9.99999974E-5 : f32
      %183 = vector.broadcast %cst_61 : f32 to vector<1x128xf32>
      %184 = arith.cmpf ogt, %182, %183 : vector<1x128xf32>
      %cst_62 = arith.constant 0.000000e+00 : f32
      %185 = vector.shape_cast %184 : vector<1x128xi1> to vector<1x128xi1>
      %186 = vector.broadcast %185 : vector<1x128xi1> to vector<3x128xi1>
      %187 = vector.broadcast %cst_62 : f32 to vector<3x128xf32>
      %188 = arith.select %186, %175, %187 : vector<3x128xi1>, vector<3x128xf32>
      %cst_63 = arith.constant 5.000000e-01 : f32
      %189 = vector.broadcast %cst_63 : f32 to vector<3x128xf32>
      %190 = arith.addf %188, %189 : vector<3x128xf32>
      %cst_64 = arith.constant 0.000000e+00 : f32
      %cst_65 = arith.constant 1.000000e+00 : f32
      %191 = vector.broadcast %cst_64 : f32 to vector<3x128xf32>
      %192 = arith.maximumf %191, %190 : vector<3x128xf32>
      %193 = vector.broadcast %cst_65 : f32 to vector<3x128xf32>
      %194 = arith.minimumf %193, %192 : vector<3x128xf32>
      %cst_66 = arith.constant 1.000000e+00 : f32
      %195 = vector.broadcast %cst_66 : f32 to vector<1x128xf32>
      %196 = arith.subf %195, %181 : vector<1x128xf32>
      %197 = arith.mulf %arg7, %196 : vector<1x128xf32>
      %198 = arith.addf %arg8, %182 : vector<1x128xf32>
      %199 = vector.broadcast %182 : vector<1x128xf32> to vector<3x128xf32>
      %200 = arith.mulf %199, %194 : vector<3x128xf32>
      %201 = arith.addf %arg9, %200 : vector<3x128xf32>
      %202 = arith.mulf %182, %80 : vector<1x128xf32>
      %203 = arith.addf %arg10, %202 : vector<1x128xf32>
      scf.yield %197, %198, %201, %203 : vector<1x128xf32>, vector<1x128xf32>, vector<3x128xf32>, vector<1x128xf32>
    }
    %c51_i32_28 = arith.constant 51 : i32
    %cst_29 = arith.constant 1.000000e+00 : f32
    %67 = vector.broadcast %cst_29 : f32 to vector<1x128xf32>
    %68 = arith.subf %67, %66#1 : vector<1x128xf32>
    %69 = vector.broadcast %68 : vector<1x128xf32> to vector<3x128xf32>
    %70 = arith.addf %66#2, %69 : vector<3x128xf32>
    %cst_30 = arith.constant 0.000000e+00 : f32
    %cst_31 = arith.constant 1.000000e+00 : f32
    %71 = vector.broadcast %cst_30 : f32 to vector<3x128xf32>
    %72 = arith.maximumf %71, %70 : vector<3x128xf32>
    %73 = vector.broadcast %cst_31 : f32 to vector<3x128xf32>
    %74 = arith.minimumf %73, %72 : vector<3x128xf32>
    %75 = tpu.concatenate %74, %66#3 in 0 : vector<3x128xf32>, vector<1x128xf32> -> vector<4x128xf32>
    %c0_32 = arith.constant 0 : index
    %c0_33 = arith.constant 0 : index
    %76 = vector.load %arg5[%c0_32, %c0_33] : memref<4x128xf32, #tpu.memory_space<vmem>>, vector<4x128xf32>
    tpu.vector_store %arg5[%c0_32, %c0_33], %75 {strides = array<i32>} : memref<4x128xf32, #tpu.memory_space<vmem>>, vector<4x128xf32>,
    return
  }
  func.func @transform_0(%arg0: i32) -> (i32, i32) {
    %c0_i32 = arith.constant 0 : i32
    %c0_i32_0 = arith.constant 0 : i32
    return %c0_i32, %arg0 : i32, i32
  }
  func.func @transform_1(%arg0: i32) -> (i32, i32) {
    %c0_i32 = arith.constant 0 : i32
    %c0_i32_0 = arith.constant 0 : i32
    return %c0_i32, %arg0 : i32, i32
  }
  func.func @transform_2(%arg0: i32) -> (i32, i32) {
    %c0_i32 = arith.constant 0 : i32
    %c0_i32_0 = arith.constant 0 : i32
    %c0_i32_1 = arith.constant 0 : i32
    return %c0_i32, %c0_i32_0 : i32, i32
  }
  func.func @transform_3(%arg0: i32) -> (i32, i32) {
    %c0_i32 = arith.constant 0 : i32
    %c0_i32_0 = arith.constant 0 : i32
    %c0_i32_1 = arith.constant 0 : i32
    return %c0_i32, %c0_i32_0 : i32, i32
  }
  func.func @transform_4(%arg0: i32) -> (i32, i32) {
    %c0_i32 = arith.constant 0 : i32
    %c0_i32_0 = arith.constant 0 : i32
    return %c0_i32, %arg0 : i32, i32
  }
}

</mosaic_0001>

<bundles_post_ra>
// kernel: tensor_rf_forward.1
= control target key start
LH: loop header
LB: loop body
LE: loop exit
PB: predicated region body
PF: predicated region fallthrough
CT: control target
= control target key end

     0   :  { %vm132_vm0 = vcmask 1042432   ;;  %vm197_vm1 = vcmask 1040384   ;;  %vm199_vm3 = vcmask 1041408   ;;  %vm202_vm4 = vcmask 1043456   ;;  %s3496_s2 = inlined_call_operand.vmem [shape: bf16[768,48], index: 2, kind: input, shape index: {}]   ;;  %s3497_s4 = inlined_call_operand.vmem [shape: f32[4,128], index: 4, kind: output, shape index: {}]   ;;  %s3498_s1 = inlined_call_operand.vmem [shape: f32[3,128], index: 1, kind: input, shape index: {}]   ;;  %s3499_s3 = inlined_call_operand.vmem [shape: bf16[28,384], index: 3, kind: input, shape index: {}]   ;;  %s3500_s0 = inlined_call_operand.vmem [shape: f32[3,128], index: 0, kind: input, shape index: {}]  }
   0x1   :  { %v2276_v0 = vld [vmem:[%s3496_s2] sm:$0xf]  ;;  %v2281_v1 = vld [vmem:[%s3496_s2 + $0x4] sm:$0xf]  ;;  %v2286_v2 = vld [vmem:[%s3496_s2 + $0x8] sm:$0xf] }
   0x2   :  { %3533 = vst [vmem:[#allocation2_spill] sm:$0xff] %v2276_v0  ;;  %3534 = vst [vmem:[#allocation3_spill] sm:$0xff] %v2281_v1  ;;  %v2291_v3 = vld [vmem:[%s3496_s2 + $0xc] sm:$0xf]  ;;  %v2296_v4 = vld [vmem:[%s3496_s2 + $0x10] sm:$0xf] }
   0x3   :  { %3535 = vst [vmem:[#allocation4_spill] sm:$0xff] %v2286_v2  ;;  %3536 = vst [vmem:[#allocation5_spill] sm:$0xff] %v2291_v3  ;;  %v2301_v5 = vld [vmem:[%s3496_s2 + $0x14] sm:$0xf]  ;;  %v2306_v6 = vld [vmem:[%s3496_s2 + $0x18] sm:$0xf] }
   0x4   :  { %3537 = vst [vmem:[#allocation6_spill] sm:$0xff] %v2296_v4  ;;  %3538 = vst [vmem:[#allocation7_spill] sm:$0xff] %v2301_v5  ;;  %v2311_v7 = vld [vmem:[%s3496_s2 + $0x1c] sm:$0xf]  ;;  %v2316_v8 = vld [vmem:[%s3496_s2 + $0x20] sm:$0xf] }
   0x5   :  { %3539 = vst [vmem:[#allocation8_spill] sm:$0xff] %v2306_v6  ;;  %3540 = vst [vmem:[#allocation9_spill] sm:$0xff] %v2311_v7  ;;  %v2321_v9 = vld [vmem:[%s3496_s2 + $0x24] sm:$0xf]  ;;  %v2326_v10 = vld [vmem:[%s3496_s2 + $0x28] sm:$0xf] }
   0x6   :  { %3541 = vst [vmem:[#allocation10_spill] sm:$0xff] %v2316_v8  ;;  %3542 = vst [vmem:[#allocation11_spill] sm:$0xff] %v2321_v9  ;;  %v2331_v11 = vld [vmem:[%s3496_s2 + $0x2c] sm:$0xf]  ;;  %v2336_v12 = vld [vmem:[%s3496_s2 + $0x30] sm:$0xf] }
   0x7   :  { %3543 = vst [vmem:[#allocation12_spill] sm:$0xff] %v2326_v10  ;;  %3544 = vst [vmem:[#allocation13_spill] sm:$0xff] %v2331_v11  ;;  %v2341_v13 = vld [vmem:[%s3496_s2 + $0x34] sm:$0xf]  ;;  %v2346_v14 = vld [vmem:[%s3496_s2 + $0x38] sm:$0xf] }
   0x8   :  { %3545 = vst [vmem:[#allocation14_spill] sm:$0xff] %v2336_v12  ;;  %3546 = vst [vmem:[#allocation15_spill] sm:$0xff] %v2341_v13  ;;  %v2351_v15 = vld [vmem:[%s3496_s2 + $0x3c] sm:$0xf]  ;;  %v2356_v16 = vld [vmem:[%s3496_s2 + $0x40] sm:$0xf] }
   0x9   :  { %3547 = vst [vmem:[#allocation16_spill] sm:$0xff] %v2346_v14  ;;  %3548 = vst [vmem:[#allocation17_spill] sm:$0xff] %v2351_v15  ;;  %v2361_v17 = vld [vmem:[%s3496_s2 + $0x44] sm:$0xf]  ;;  %v2366_v18 = vld [vmem:[%s3496_s2 + $0x48] sm:$0xf] }
   0xa   :  { %3549 = vst [vmem:[#allocation18_spill] sm:$0xff] %v2356_v16  ;;  %3550 = vst [vmem:[#allocation19_spill] sm:$0xff] %v2361_v17  ;;  %v2371_v19 = vld [vmem:[%s3496_s2 + $0x4c] sm:$0xf]  ;;  %v2376_v20 = vld [vmem:[%s3496_s2 + $0x50] sm:$0xf] }
   0xb   :  { %3551 = vst [vmem:[#allocation20_spill] sm:$0xff] %v2366_v18  ;;  %3552 = vst [vmem:[#allocation21_spill] sm:$0xff] %v2371_v19  ;;  %v2381_v21 = vld [vmem:[%s3496_s2 + $0x54] sm:$0xf]  ;;  %v2386_v22 = vld [vmem:[%s3496_s2 + $0x58] sm:$0xf] }
   0xc   :  { %3553 = vst [vmem:[#allocation22_spill] sm:$0xff] %v2376_v20  ;;  %3554 = vst [vmem:[#allocation23_spill] sm:$0xff] %v2381_v21  ;;  %v2391_v23 = vld [vmem:[%s3496_s2 + $0x5c] sm:$0xf]  ;;  %v2396_v24 = vld [vmem:[%s3496_s2 + $0x60] sm:$0xf] }
   0xd   :  { %3555 = vst [vmem:[#allocation24_spill] sm:$0xff] %v2386_v22  ;;  %3556 = vst [vmem:[#allocation25_spill] sm:$0xff] %v2391_v23  ;;  %v2401_v25 = vld [vmem:[%s3496_s2 + $0x64] sm:$0xf]  ;;  %v2406_v26 = vld [vmem:[%s3496_s2 + $0x68] sm:$0xf] }
   0xe   :  { %3557 = vst [vmem:[#allocation26_spill] sm:$0xff] %v2396_v24  ;;  %3558 = vst [vmem:[#allocation27_spill] sm:$0xff] %v2401_v25  ;;  %v2411_v27 = vld [vmem:[%s3496_s2 + $0x6c] sm:$0xf]  ;;  %v2416_v28 = vld [vmem:[%s3496_s2 + $0x70] sm:$0xf] }
   0xf   :  { %3559 = vst [vmem:[#allocation28_spill] sm:$0xff] %v2406_v26  ;;  %3560 = vst [vmem:[#allocation29_spill] sm:$0xff] %v2411_v27  ;;  %v2421_v29 = vld [vmem:[%s3496_s2 + $0x74] sm:$0xf]  ;;  %v2426_v30 = vld [vmem:[%s3496_s2 + $0x78] sm:$0xf] }
  0x10   :  { %3561 = vst [vmem:[#allocation30_spill] sm:$0xff] %v2416_v28  ;;  %3562 = vst [vmem:[#allocation31_spill] sm:$0xff] %v2421_v29  ;;  %v2431_v31 = vld [vmem:[%s3496_s2 + $0x7c] sm:$0xf]  ;;  %v2436_v32 = vld [vmem:[%s3496_s2 + $0x80] sm:$0xf] }
  0x11   :  { %3563 = vst [vmem:[#allocation32_spill] sm:$0xff] %v2426_v30  ;;  %3564 = vst [vmem:[#allocation33_spill] sm:$0xff] %v2431_v31  ;;  %v2441_v33 = vld [vmem:[%s3496_s2 + $0x84] sm:$0xf]  ;;  %v2446_v34 = vld [vmem:[%s3496_s2 + $0x88] sm:$0xf] }
  0x12   :  { %3565 = vst [vmem:[#allocation34_spill] sm:$0xff] %v2436_v32  ;;  %3566 = vst [vmem:[#allocation35_spill] sm:$0xff] %v2441_v33  ;;  %v2451_v35 = vld [vmem:[%s3496_s2 + $0x8c] sm:$0xf]  ;;  %v2456_v36 = vld [vmem:[%s3496_s2 + $0x90] sm:$0xf] }
  0x13   :  { %3567 = vst [vmem:[#allocation36_spill] sm:$0xff] %v2446_v34  ;;  %3568 = vst [vmem:[#allocation37_spill] sm:$0xff] %v2451_v35  ;;  %v2461_v37 = vld [vmem:[%s3496_s2 + $0x94] sm:$0xf]  ;;  %v2466_v38 = vld [vmem:[%s3496_s2 + $0x98] sm:$0xf] }
  0x14   :  { %3569 = vst [vmem:[#allocation38_spill] sm:$0xff] %v2456_v36  ;;  %3570 = vst [vmem:[#allocation39_spill] sm:$0xff] %v2461_v37  ;;  %v2471_v39 = vld [vmem:[%s3496_s2 + $0x9c] sm:$0xf]  ;;  %v2476_v40 = vld [vmem:[%s3496_s2 + $0xa0] sm:$0xf] }
  0x15   :  { %3571 = vst [vmem:[#allocation40_spill] sm:$0xff] %v2466_v38  ;;  %3572 = vst [vmem:[#allocation41_spill] sm:$0xff] %v2471_v39  ;;  %v2481_v41 = vld [vmem:[%s3496_s2 + $0xa4] sm:$0xf]  ;;  %v2486_v42 = vld [vmem:[%s3496_s2 + $0xa8] sm:$0xf] }
  0x16   :  { %3573 = vst [vmem:[#allocation42_spill] sm:$0xff] %v2476_v40  ;;  %3574 = vst [vmem:[#allocation43_spill] sm:$0xff] %v2481_v41  ;;  %v2491_v43 = vld [vmem:[%s3496_s2 + $0xac] sm:$0xf]  ;;  %v2496_v44 = vld [vmem:[%s3496_s2 + $0xb0] sm:$0xf] }
  0x17   :  { %3575 = vst [vmem:[#allocation44_spill] sm:$0xff] %v2486_v42  ;;  %3576 = vst [vmem:[#allocation45_spill] sm:$0xff] %v2491_v43  ;;  %v2501_v45 = vld [vmem:[%s3496_s2 + $0xb4] sm:$0xf]  ;;  %v2506_v46 = vld [vmem:[%s3496_s2 + $0xb8] sm:$0xf] }
  0x18   :  { %3577 = vst [vmem:[#allocation46_spill] sm:$0xff] %v2496_v44  ;;  %3578 = vst [vmem:[#allocation47_spill] sm:$0xff] %v2501_v45  ;;  %v2511_v47 = vld [vmem:[%s3496_s2 + $0xbc] sm:$0xf]  ;;  %v2516_v48 = vld [vmem:[%s3496_s2 + $0xc0] sm:$0xf] }
  0x19   :  { %3579 = vst [vmem:[#allocation48_spill] sm:$0xff] %v2506_v46  ;;  %3580 = vst [vmem:[#allocation49_spill] sm:$0xff] %v2511_v47  ;;  %v2521_v49 = vld [vmem:[%s3496_s2 + $0xc4] sm:$0xf]  ;;  %v2526_v50 = vld [vmem:[%s3496_s2 + $0xc8] sm:$0xf] }
  0x1a   :  { %3581 = vst [vmem:[#allocation50_spill] sm:$0xff] %v2516_v48  ;;  %3582 = vst [vmem:[#allocation51_spill] sm:$0xff] %v2521_v49  ;;  %v2531_v51 = vld [vmem:[%s3496_s2 + $0xcc] sm:$0xf]  ;;  %v2536_v52 = vld [vmem:[%s3496_s2 + $0xd0] sm:$0xf] }
  0x1b   :  { %3583 = vst [vmem:[#allocation52_spill] sm:$0xff] %v2526_v50  ;;  %3584 = vst [vmem:[#allocation53_spill] sm:$0xff] %v2531_v51  ;;  %v2541_v53 = vld [vmem:[%s3496_s2 + $0xd4] sm:$0xf]  ;;  %v2546_v54 = vld [vmem:[%s3496_s2 + $0xd8] sm:$0xf] }
  0x1c   :  { %3585 = vst [vmem:[#allocation54_spill] sm:$0xff] %v2536_v52  ;;  %3586 = vst [vmem:[#allocation55_spill] sm:$0xff] %v2541_v53  ;;  %v2551_v55 = vld [vmem:[%s3496_s2 + $0xdc] sm:$0xf]  ;;  %v2556_v56 = vld [vmem:[%s3496_s2 + $0xe0] sm:$0xf] }
  0x1d   :  { %3587 = vst [vmem:[#allocation56_spill] sm:$0xff] %v2546_v54  ;;  %3588 = vst [vmem:[#allocation57_spill] sm:$0xff] %v2551_v55  ;;  %v2561_v57 = vld [vmem:[%s3496_s2 + $0xe4] sm:$0xf]  ;;  %v2566_v58 = vld [vmem:[%s3496_s2 + $0xe8] sm:$0xf] }
  0x1e   :  { %3589 = vst [vmem:[#allocation58_spill] sm:$0xff] %v2556_v56  ;;  %3590 = vst [vmem:[#allocation59_spill] sm:$0xff] %v2561_v57  ;;  %v2571_v59 = vld [vmem:[%s3496_s2 + $0xec] sm:$0xf]  ;;  %v2576_v60 = vld [vmem:[%s3496_s2 + $0xf0] sm:$0xf] }
  0x1f   :  { %3591 = vst [vmem:[#allocation60_spill] sm:$0xff] %v2566_v58  ;;  %3592 = vst [vmem:[#allocation61_spill] sm:$0xff] %v2571_v59  ;;  %v2581_v61 = vld [vmem:[%s3496_s2 + $0xf4] sm:$0xf]  ;;  %v2586_v62 = vld [vmem:[%s3496_s2 + $0xf8] sm:$0xf] }
  0x20   :  { %3593 = vst [vmem:[#allocation62_spill] sm:$0xff] %v2576_v60  ;;  %3594 = vst [vmem:[#allocation63_spill] sm:$0xff] %v2581_v61  ;;  %v2591_v63 = vld [vmem:[%s3496_s2 + $0xfc] sm:$0xf]  ;;  %v2596_v58 = vld [vmem:[%s3496_s2 + $0x100] sm:$0xf] }
  0x21   :  { %3595 = vst [vmem:[#allocation64_spill] sm:$0xff] %v2586_v62  ;;  %3596 = vst [vmem:[#allocation65_spill] sm:$0xff] %v2591_v63  ;;  %v2601_v59 = vld [vmem:[%s3496_s2 + $0x104] sm:$0xf]  ;;  %v2606_v56 = vld [vmem:[%s3496_s2 + $0x108] sm:$0xf] }
  0x22   :  { %3597 = vst [vmem:[#allocation66_spill] sm:$0xff] %v2596_v58  ;;  %3598 = vst [vmem:[#allocation67_spill] sm:$0xff] %v2601_v59  ;;  %v2611_v57 = vld [vmem:[%s3496_s2 + $0x10c] sm:$0xf]  ;;  %v2616_v54 = vld [vmem:[%s3496_s2 + $0x110] sm:$0xf] }
  0x23   :  { %3599 = vst [vmem:[#allocation68_spill] sm:$0xff] %v2606_v56  ;;  %3600 = vst [vmem:[#allocation69_spill] sm:$0xff] %v2611_v57  ;;  %v2621_v55 = vld [vmem:[%s3496_s2 + $0x114] sm:$0xf]  ;;  %v2626_v52 = vld [vmem:[%s3496_s2 + $0x118] sm:$0xf] }
  0x24   :  { %3601 = vst [vmem:[#allocation70_spill] sm:$0xff] %v2616_v54  ;;  %3602 = vst [vmem:[#allocation71_spill] sm:$0xff] %v2621_v55  ;;  %v2631_v53 = vld [vmem:[%s3496_s2 + $0x11c] sm:$0xf]  ;;  %v2636_v50 = vld [vmem:[%s3496_s2 + $0x120] sm:$0xf] }
  0x25   :  { %3603 = vst [vmem:[#allocation72_spill] sm:$0xff] %v2626_v52  ;;  %3604 = vst [vmem:[#allocation73_spill] sm:$0xff] %v2631_v53  ;;  %v2641_v51 = vld [vmem:[%s3496_s2 + $0x124] sm:$0xf]  ;;  %v2646_v48 = vld [vmem:[%s3496_s2 + $0x128] sm:$0xf] }
  0x26   :  { %3605 = vst [vmem:[#allocation74_spill] sm:$0xff] %v2636_v50  ;;  %3606 = vst [vmem:[#allocation75_spill] sm:$0xff] %v2641_v51  ;;  %v2651_v49 = vld [vmem:[%s3496_s2 + $0x12c] sm:$0xf]  ;;  %v2656_v46 = vld [vmem:[%s3498_s1] sm:$0x7] }
  0x27   :  { %3607 = vst [vmem:[#allocation76_spill] sm:$0xff] %v2646_v48  ;;  %3608 = vst [vmem:[#allocation77_spill] sm:$0xff] %v2651_v49  ;;  %v2661_v47 = vld [vmem:[%s3496_s2 + $0x130] sm:$0xf]  ;;  %v2666_v44 = vld [vmem:[%s3496_s2 + $0x134] sm:$0xf] }
  0x28   :  { %3609 = vst [vmem:[#allocation78_spill] sm:$0xff] %v2656_v46  ;;  %3610 = vst [vmem:[#allocation79_spill] sm:$0xff] %v2661_v47  ;;  %v2671_v45 = vld [vmem:[%s3496_s2 + $0x138] sm:$0xf]  ;;  %v2676_v42 = vld [vmem:[%s3496_s2 + $0x13c] sm:$0xf] }
  0x29   :  { %3611 = vst [vmem:[#allocation80_spill] sm:$0xff] %v2666_v44  ;;  %3612 = vst [vmem:[#allocation81_spill] sm:$0xff] %v2671_v45  ;;  %v2681_v43 = vld [vmem:[%s3496_s2 + $0x140] sm:$0xf]  ;;  %v2686_v40 = vld [vmem:[%s3496_s2 + $0x144] sm:$0xf] }
  0x2a   :  { %3613 = vst [vmem:[#allocation82_spill] sm:$0xff] %v2676_v42  ;;  %3614 = vst [vmem:[#allocation83_spill] sm:$0xff] %v2681_v43  ;;  %v2691_v41 = vld [vmem:[%s3496_s2 + $0x148] sm:$0xf]  ;;  %v2696_v38 = vld [vmem:[%s3496_s2 + $0x14c] sm:$0xf] }
  0x2b   :  { %3615 = vst [vmem:[#allocation84_spill] sm:$0xff] %v2686_v40  ;;  %3616 = vst [vmem:[#allocation85_spill] sm:$0xff] %v2691_v41  ;;  %v2701_v39 = vld [vmem:[%s3496_s2 + $0x150] sm:$0xf]  ;;  %v2706_v36 = vld [vmem:[%s3496_s2 + $0x154] sm:$0xf] }
  0x2c   :  { %3617 = vst [vmem:[#allocation86_spill] sm:$0xff] %v2696_v38  ;;  %3618 = vst [vmem:[#allocation87_spill] sm:$0xff] %v2701_v39  ;;  %v2711_v37 = vld [vmem:[%s3496_s2 + $0x158] sm:$0xf]  ;;  %v2716_v34 = vld [vmem:[%s3496_s2 + $0x15c] sm:$0xf] }
  0x2d   :  { %3619 = vst [vmem:[#allocation88_spill] sm:$0xff] %v2706_v36  ;;  %3620 = vst [vmem:[#allocation89_spill] sm:$0xff] %v2711_v37  ;;  %v2721_v35 = vld [vmem:[%s3496_s2 + $0x160] sm:$0xf]  ;;  %v2726_v32 = vld [vmem:[%s3496_s2 + $0x164] sm:$0xf]  ;;  %v210_v37 = vlaneseq }
  0x2e   :  { %3621 = vst [vmem:[#allocation90_spill] sm:$0xff] %v2716_v34  ;;  %3622 = vst [vmem:[#allocation91_spill] sm:$0xff] %v2721_v35  ;;  %v2731_v33 = vld [vmem:[%s3496_s2 + $0x168] sm:$0xf]  ;;  %v2736_v30 = vld [vmem:[%s3496_s2 + $0x16c] sm:$0xf] }
  0x2f   :  { %3623 = vst [vmem:[#allocation92_spill] sm:$0xff] %v2726_v32  ;;  %3624 = vst [vmem:[#allocation93_spill] sm:$0xff] %v2731_v33  ;;  %v2741_v31 = vld [vmem:[%s3496_s2 + $0x170] sm:$0xf]  ;;  %v2746_v35 = vld [vmem:[%s3496_s2 + $0x174] sm:$0xf]  ;;  %v140_v32 = vmul.f32 %v2656_v46, %v2656_v46 }
  0x30   :  { %3625 = vst [vmem:[#allocation94_spill] sm:$0xff] %v2736_v30  ;;  %3626 = vst [vmem:[#allocation95_spill] sm:$0xff] %v2741_v31  ;;  %v2753_v33 = vld [vmem:[%s3496_s2 + $0x178] sm:$0xf]  ;;  %v2758_v30 = vld [vmem:[%s3496_s2 + $0x17c] sm:$0xf] }
  0x31   :  { %3627 = vst [vmem:[#allocation96_spill] sm:$0xff] %v2746_v35  ;;  %3628 = vst [vmem:[#allocation97_spill] sm:$0xff] %v2753_v33  ;;  %v2763_v31 = vld [vmem:[%s3499_s3] sm:$0xff]  ;;  %vm124_vm2 = vcmp.eq.f32.partialorder %v2656_v46, 0.0  ;;  %v2769_v35 = vld [vmem:[%s3499_s3 + $0x8] sm:$0xf] }
  0x32   :  { %3629 = vst [vmem:[#allocation98_spill] sm:$0xff] %v2758_v30  ;;  %3630 = vst [vmem:[#allocation99_spill] sm:$0xff] %v2763_v31  ;;  %v2774_v33 = vld [vmem:[%s3499_s3 + $0xc] sm:$0xff]  ;;  %v2779_v30 = vld [vmem:[%s3499_s3 + $0x14] sm:$0xf]  ;;  %v160_v29 = vrot.slane %v2656_v46, 1 }
  0x33   :  { %3631 = vst [vmem:[#allocation100_spill] sm:$0xff] %v2769_v35  ;;  %3632 = vst [vmem:[#allocation101_spill] sm:$0xff] %v2774_v33  ;;  %v2784_v31 = vld [vmem:[%s3499_s3 + $0x18] sm:$0xff]  ;;  %v2789_v35 = vld [vmem:[%s3499_s3 + $0x20] sm:$0xf]  ;;  %v165_v36 = vmul.f32 2.0, %v2656_v46 }
  0x34   :  { %3633 = vst [vmem:[#allocation102_spill] sm:$0xff] %v2779_v30  ;;  %3634 = vst [vmem:[#allocation103_spill] sm:$0xff] %v2784_v31  ;;  %v2794_v33 = vld [vmem:[%s3499_s3 + $0x24] sm:$0x33]  ;;  %v2799_v30 = vld [vmem:[%s3500_s0] sm:$0x7] }
  0x35   :  { %3635 = vst [vmem:[#allocation104_spill] sm:$0xff] %v2789_v35  ;;  %3636 = vst [vmem:[#allocation105_spill] sm:$0xff] %v2794_v33  ;;  %v2804_v31 = vld [vmem:[%s3499_s3 + $0x2c] sm:$0x3]  ;;  %v125_v28 = vsel %vm124_vm2, 1e-06, %v2656_v46 }
  0x36   :  { %3637 = vst [vmem:[#allocation106_spill] sm:$0xff] %v2799_v30  ;;  %3638 = vst [vmem:[#allocation107_spill] sm:$0xff] %v2804_v31  ;;  %v141_v35 = vsel %vm132_vm0, %v140_v32, 0.0  ;;  %2200 = vrcp.f32 %v125_v28  ;;  %v156_v34 = vmul.f32 -0.48860252, %v2656_v46  ;;  %v168_v31 = vrot.slane %v140_v32, 6 }
  0x37   :  { %v142_v33 = vrot.slane %v141_v35, 4  ;;  %v157_v26 = vmul.f32 0.48860252, %v2656_v46  ;;  %v158_v27 = vmul.f32 1.0925485, %v2656_v46  ;;  %v171_v25 = vrot.slane %v140_v32, 7 }
  0x38   :  { %v163_v39 = vmul.f32 -1.0925485, %v2656_v46  ;;  %v175_v41 = vrot.slane %v2656_v46, 2  ;;  %v178_v38 = vrot.slane %v140_v32, 1  ;;  %v166_v28 = vmul.f32 %v165_v36, %v2656_v46  ;;  %s2850_s0 = smov 0  }
  0x39   :  { %v143_v24 = vadd.f32 %v142_v33, %v141_v35  ;;  %v162_v22 = vmul.f32 %v160_v29, %v158_v27  ;;  %v183_v43 = vrot.slane %v156_v34, 5  ;;  %v126_v40 = vsub.f32 1.0, %v2799_v30 }
  0x3a   :  { %v164_v23 = vmul.f32 %v163_v39, %v160_v29  ;;  %v180_v21 = vsub.f32 %v140_v32, %v178_v38  ;;  %v198_v45 = vsel %vm197_vm1, 0.2820948, %v156_v34  ;;  %v170_v42 = vsub.f32 %v166_v28, %v168_v31 }
  0x3b   :  { %v144_v20 = vrot.slane %v143_v24, 2  ;;  %v177_v18 = vmul.f32 %v175_v41, %v163_v39  ;;  %v186_v19 = vrot.slane %v162_v22, 4  ;;  %v200_v33 = vsel %vm199_vm3, %v198_v45, %v157_v26 }
  0x3c   :  { %v2819_v47 = vmul.f32 0.54627424, %v180_v21  ;;  %v189_v44 = vrot.slane %v164_v23, 4  ;;  %v201_v27 = vsel %vm132_vm0, %v200_v33, %v183_v43  ;;  %v129_v29 = vsub.f32 -1.0, %v2799_v30 }
  0x3d   :  { %v145_v35 = vadd.f32 %v144_v20, %v143_v24  ;;  %v173_v36 = vsub.f32 %v170_v42, %v171_v25  ;;  %v203_v16 = vsel %vm202_vm4, %v201_v27, %v186_v19  ;;  %vm204_vm5 = vcmask 1044480  }
  0x3e   :  { %3639 = vst [vmem:[#allocation108_spill] sm:$0xff] %v2819_v47  ;;  %v2824_v38 = vshrl.u32 %v210_v37, 7  ;;  %v195_v34 = vrot.slane %v177_v18, 1  ;;  %vm206_vm6 = vcmask 1045504   ;;  %v205_v20 = vsel %vm204_vm5, %v203_v16, %v189_v44 }
  0x3f   :  { %v146_v32 = vrot.slane %v145_v35, 1  ;;  %v174_v31 = vmul.f32 0.31539157, %v173_v36  ;;  %vm208_vm7 = vcmask 1046528  }
  0x40   :  { %3640 = vst [vmem:[#allocation109_spill] sm:$0xff] %v2824_v38  ;;  %v2201_v22 = vpop.eup %2200  ;;  %v212_v21 = vadd.s32 8, %v2824_v38  ;;  %v2829_v23 = vcvt.s32.f32 %v2824_v38 }
  0x41   :  { %v147_v26 = vadd.f32 %v146_v32, %v145_v35  ;;  %v128_v24 = vmul.f32 %v2201_v22, %v126_v40  ;;  %v130_v25 = vmul.f32 %v2201_v22, %v129_v29  ;;  %v192_v39 = vrot.slane %v174_v31, 4 }
  0x42   :  { %3641 = vst [vmem:[#allocation110_spill] sm:$0xff] %v2829_v23  ;;  %v2832_v41 = vcvt.s32.f32 %v212_v21  ;;  %v2842_v31 = vmov 0.0   ;;  %v2846_v22 = vmov 0.0  }
  0x43   :  { %2202 = vrsqrt.f32 %v147_v26  ;;  %v131_v19 = vmin.f32 %v128_v24, %v130_v25  ;;  %v207_v37 = vsel %vm206_vm6, %v205_v20, %v192_v39  ;;  %vm150_vm8 = vcmp.eq.f32.partialorder %v147_v26, inf }
  0x44   :  { %3642 = vst [vmem:[#allocation111_spill] sm:$0xff] %v2832_v41  ;;  %v2835_v18 = vsel %vm208_vm7, %v207_v37, %v195_v34  ;;  %v153_v40 = vand.u32 2147483648, %v147_v26  ;;  %vm152_vm9 = vcmp.eq.f32.partialorder %v147_v26, 0.0  ;;  %v2844_v34 = vmov 0.0  }
  0x45   :  { %3643 = vst [vmem:[#allocation112_spill] sm:$0xff] %v2835_v18  ;;  %v133_v16 = vsel %vm132_vm0, %v131_v19, -inf  ;;  %v2848_v20 = vmov 1.0  }
  0x46   :  { %v134_v42 = vrot.slane %v133_v16, 4 }
  0x48   :  { %v135_v43 = vmax.f32 %v133_v16, %v134_v42 }
  0x4a   :  { %v136_v44 = vrot.slane %v135_v43, 2 }
  0x4c   :  { %v137_v28 = vmax.f32 %v135_v43, %v136_v44 }
  0x4d   :  { %v2203_v45 = vpop.eup %2202 }
  0x4e   :  { %v149_v33 = vmul.f32 %v2203_v45, %v147_v26  ;;  %v138_v35 = vrot.slane %v137_v28, 1 }
  0x50   :  { %v151_v27 = vsel %vm150_vm8, %v147_v26, %v149_v33  ;;  %v2838_v29 = vmax.f32 %v137_v28, %v138_v35 }
  0x51   :  { %v154_v36 = vsel %vm152_vm9, %v153_v40, %v151_v27 }
  0x52   :  { %3644 = vst [vmem:[#allocation113_spill] sm:$0xff] %v2838_v29  ;;  %v2840_v32 = vmul.f32 0.06666667, %v154_v36 }
  0x54   :  { %3645 = vst [vmem:[#allocation114_spill] sm:$0xff] %v2840_v32 }
  0x55 LB: > { %v3646_v41 = vld [vmem:[#allocation111_spill] sm:$0xff]  ;;  %v3647_v38 = vld [vmem:[#allocation109_spill] sm:$0xff]  ;;  %v3648_v23 = vld [vmem:[#allocation110_spill] sm:$0xff]  ;;  %3649 = vst [vmem:[#allocation115_spill] sm:$0xff] %v2228_v31  ;;  %vm532_vm10 = vcmask 392192   ;;  %s225_s3 = scvt.s32.f32 %s2244_s0  ;;  %s220_s0 = sadd.s32 1, %s2244_s0   ;;  %v2236_v22 = vphi %v2846_v22, %v3824_v22   ;;  %v2232_v34 = vphi %v2844_v34, %v3823_v34   ;;  %v2228_v31 = vphi %v2842_v31, %v3822_v31   ;;  %s2244_s0 = sphi %s2850_s0, %s220_s0   ;;  %v2240_v20 = vphi %v2848_v20, %v3825_v20  }
  0x56   : > { %3650 = vst [vmem:[#allocation116_spill] sm:$0xff] %v2232_v34  ;;  %3651 = vst [vmem:[#allocation117_spill] sm:$0xff] %v2236_v22  ;;  %v3653_v1 = vld [vmem:[#allocation3_spill] sm:$0xff]  ;;  %v3654_v0 = vld [vmem:[#allocation2_spill] sm:$0xff]  ;;  %v2884_v44 = vsub.s32 0, %v3647_v38  ;;  %v267_v45 = vsub.s32 1, %v3647_v38 }
  0x57   : > { %3652 = vst [vmem:[#allocation118_spill] sm:$0xff] %v2240_v20  ;;  %v1839_v26 = vcombine.low %v3654_v0, %v3653_v1  ;;  %v3655_v61 = vld [vmem:[#allocation63_spill] sm:$0xff]  ;;  %v3656_v60 = vld [vmem:[#allocation62_spill] sm:$0xff]  ;;  %s226_s16 = smul.f32 0.06666667, %s225_s3  ;;  %v279_v28 = vsub.s32 2, %v3647_v38 }
  0x58   : > { %v1869_v21 = vcombine.low %v3656_v60, %v3655_v61  ;;  %v3659_v46 = vld [vmem:[#allocation78_spill] sm:$0xff]  ;;  %v3662_v3 = vld [vmem:[#allocation5_spill] sm:$0xff]  ;;  %v3663_v2 = vld [vmem:[#allocation4_spill] sm:$0xff]  ;;  %p217_p0 = scmp.ge.s32.totalorder %s220_s0, 51  }
  0x59   : > { %2036 = vmatprep.mubr.msk.bf16.mxu0 %vm532_vm10, %v1839_v26  ;;  %v227_v24 = vstv %s226_s16  ;;  %v3657_v29 = vld [vmem:[#allocation113_spill] sm:$0xff]  ;;  %v3660_v30 = vld [vmem:[#allocation106_spill] sm:$0xff]  ;;  %v3665_v62 = vld [vmem:[#allocation64_spill] sm:$0xff] }
  0x5a   : > { %2096 = vmatprep.mubr.msk.bf16.mxu1 %vm532_vm10, %v1869_v21  ;;  %v2875_v25 = vadd.f32 %v227_v24, %v3657_v29  ;;  %v3664_v63 = vld [vmem:[#allocation65_spill] sm:$0xff]  ;;  %v3666_v5 = vld [vmem:[#allocation7_spill] sm:$0xff]  ;;  %v3667_v4 = vld [vmem:[#allocation6_spill] sm:$0xff] }
  0x5b   : > { %v3668_v59 = vld [vmem:[#allocation67_spill] sm:$0xff]  ;;  %v3669_v58 = vld [vmem:[#allocation66_spill] sm:$0xff]  ;;  %v3670_v7 = vld [vmem:[#allocation9_spill] sm:$0xff] }
  0x5c   : > { %3658 = vst [vmem:[#allocation119_spill] sm:$0xff] %v2875_v25  ;;  %v229_v39 = vmul.f32 %v2875_v25, %v3659_v46  ;;  %v3671_v6 = vld [vmem:[#allocation8_spill] sm:$0xff]  ;;  %v3672_v57 = vld [vmem:[#allocation69_spill] sm:$0xff]  ;;  %v3674_v9 = vld [vmem:[#allocation11_spill] sm:$0xff] }
  0x5d   : > { %v3673_v56 = vld [vmem:[#allocation68_spill] sm:$0xff]  ;;  %v3675_v8 = vld [vmem:[#allocation10_spill] sm:$0xff]  ;;  %v3676_v55 = vld [vmem:[#allocation71_spill] sm:$0xff] }
  0x5e   : > { %v2880_v19 = vadd.f32 %v229_v39, %v3660_v30  ;;  %v3677_v54 = vld [vmem:[#allocation70_spill] sm:$0xff]  ;;  %v3678_v11 = vld [vmem:[#allocation13_spill] sm:$0xff]  ;;  %v3679_v10 = vld [vmem:[#allocation12_spill] sm:$0xff] }
  0x5f   : > { %v3680_v53 = vld [vmem:[#allocation73_spill] sm:$0xff]  ;;  %v3681_v52 = vld [vmem:[#allocation72_spill] sm:$0xff]  ;;  %v3682_v13 = vld [vmem:[#allocation15_spill] sm:$0xff] }
  0x60   : > { %3661 = vst [vmem:[#allocation120_spill] sm:$0xff] %v2880_v19  ;;  %v248_v37 = vadd.f32 1.0, %v2880_v19  ;;  %v3683_v12 = vld [vmem:[#allocation14_spill] sm:$0xff]  ;;  %v3684_v51 = vld [vmem:[#allocation75_spill] sm:$0xff]  ;;  %v3686_v15 = vld [vmem:[#allocation17_spill] sm:$0xff] }
  0x61   : > { %v3685_v50 = vld [vmem:[#allocation74_spill] sm:$0xff]  ;;  %v3687_v14 = vld [vmem:[#allocation16_spill] sm:$0xff]  ;;  %v3688_v49 = vld [vmem:[#allocation77_spill] sm:$0xff] }
  0x62   : > { %v249_v16 = vmul.f32 0.5, %v248_v37  ;;  %v3689_v48 = vld [vmem:[#allocation76_spill] sm:$0xff]  ;;  %v3690_v17 = vld [vmem:[#allocation19_spill] sm:$0xff] }
  0x64   : > { %v1838_v42 = vadd.f32 -1.0, %v249_v16 }
  0x66   : > { %v251_v43 = vadd.f32 1.0, %v1838_v42 }
  0x68   : > { %v252_v40 = vmul.f32 7.5, %v251_v43 }
  0x6a   : > { %v256_v33 = vrot.slane %v252_v40, %v2884_v44  ;;  %v268_v35 = vrot.slane %v252_v40, %v267_v45  ;;  %v280_v27 = vrot.slane %v252_v40, %v279_v28 }
  0x6c   : > { %v257_v36 = vsub.f32 %v256_v33, %v3648_v23  ;;  %v258_v26 = vsub.f32 %v256_v33, %v3646_v41  ;;  %v269_v21 = vsub.f32 %v268_v35, %v3648_v23  ;;  %v270_v24 = vsub.f32 %v268_v35, %v3646_v41 }
  0x6d   : > { %v281_v39 = vsub.f32 %v280_v27, %v3648_v23  ;;  %v282_v37 = vsub.f32 %v280_v27, %v3646_v41 }
  0x6e   : > { %v259_v16 = vand.u32 2147483647, %v257_v36  ;;  %v260_v42 = vand.u32 2147483647, %v258_v26  ;;  %v271_v0 = vand.u32 2147483647, %v269_v21 }
  0x6f   : > { %v272_v43 = vand.u32 2147483647, %v270_v24  ;;  %v283_v1 = vand.u32 2147483647, %v281_v39  ;;  %v284_v29 = vand.u32 2147483647, %v282_v37  ;;  %v1842_v24 = vcombine.low %v3671_v6, %v3670_v7 }
  0x70   : > { %v261_v45 = vsub.f32 1.0, %v259_v16  ;;  %v262_v28 = vsub.f32 1.0, %v260_v42  ;;  %v273_v40 = vsub.f32 1.0, %v271_v0  ;;  %v1872_v39 = vcombine.low %v3673_v56, %v3672_v57 }
  0x71   : > { %v274_v30 = vsub.f32 1.0, %v272_v43  ;;  %v285_v46 = vsub.f32 1.0, %v283_v1  ;;  %v286_v33 = vsub.f32 1.0, %v284_v29  ;;  %v1840_v1 = vcombine.low %v3663_v2, %v3662_v3 }
  0x72   : > { %v2895_v60 = vmax.f32 %v261_v45, 0.0  ;;  %v2897_v61 = vmax.f32 %v262_v28, 0.0  ;;  %v2899_v35 = vmax.f32 %v273_v40, 0.0  ;;  %v1871_v29 = vcombine.low %v3669_v58, %v3668_v59 }
  0x73   : > { %v2901_v23 = vmax.f32 %v274_v30, 0.0  ;;  %v287_v36 = vmax.f32 %v285_v46, 0.0  ;;  %v288_v26 = vmax.f32 %v286_v33, 0.0  ;;  %v1870_v30 = vcombine.low %v3665_v62, %v3664_v63 }
  0x74   : > { %v289_v27 = vpack.c.bf16 %v2897_v61, %v2895_v60  ;;  %v1841_v46 = vcombine.low %v3667_v4, %v3666_v5  ;;  %v1843_v37 = vcombine.low %v3675_v8, %v3674_v9  ;;  %v1873_v16 = vcombine.low %v3677_v54, %v3676_v55 }
  0x75   : > { %v290_v21 = vpack.c.bf16 %v2901_v23, %v2899_v35  ;;  %v291_v0 = vpack.c.bf16 %v288_v26, %v287_v36  ;;  %v1844_v42 = vcombine.low %v3679_v10, %v3678_v11  ;;  %v1874_v43 = vcombine.low %v3681_v52, %v3680_v53  ;;  %v3692_v26 = vld [vmem:[#allocation80_spill] sm:$0xff] }
  0x76   : > { %2030 = vmatprep.subr.bf16.mxu0 %v289_v27  ;;  %2152 = vmatprep.subr.bf16.mxu1 %v289_v27  ;;  %v1845_v45 = vcombine.low %v3683_v12, %v3682_v13  ;;  %v1875_v28 = vcombine.low %v3685_v50, %v3684_v51  ;;  %v1846_v40 = vcombine.low %v3687_v14, %v3686_v15 }
  0x77   : > { %2031 = vmatpush3.bf16.msra.mxu0 %v289_v27  ;;  %2155 = vmatpush3.bf16.msra.mxu1 %v289_v27  ;;  %v1876_v33 = vcombine.low %v3689_v48, %v3688_v49  ;;  %v3691_v27 = vld [vmem:[#allocation18_spill] sm:$0xff] }
  0x78   : > { %2032 = vmatprep.subr.bf16.mxu0 %v290_v21  ;;  %2153 = vmatprep.subr.bf16.mxu1 %v290_v21  ;;  %v1847_v36 = vcombine.low %v3691_v27, %v3690_v17  ;;  %v1098_v17 = vcombine.high %v2895_v60, %v2895_v60 }
  0x7b   : > { %2033 = vmatpush3.bf16.msra.mxu0 %v290_v21  ;;  %2156 = vmatpush3.bf16.msra.mxu1 %v290_v21  ;;  %v3693_v21 = vld [vmem:[#allocation79_spill] sm:$0xff] }
  0x7c   : > { %2034 = vmatprep.subr.bf16.mxu0 %v291_v0  ;;  %2154 = vmatprep.subr.bf16.mxu1 %v291_v0 }
  0x7f   : > { %2035 = vmatpush3.bf16.msra.mxu0 %v291_v0  ;;  %2157 = vmatpush3.bf16.msra.mxu1 %v291_v0  ;;  %v1877_v0 = vcombine.low %v3693_v21, %v3692_v26  ;;  %v3705_v26 = vld [vmem:[#allocation85_spill] sm:$0xff] }
  0x82   : > { %2037 = vmatmul.mubr.msk.bf16.vlgmr.msra.gmra.mrb[0].mxu0 %vm532_vm10, %v1840_v1  ;;  %2097 = vmatmul.mubr.msk.bf16.vlgmr.msra.gmra.mrb[0].mxu1 %vm532_vm10, %v1870_v30  ;;  %v3694_v1 = vld [vmem:[#allocation21_spill] sm:$0xff]  ;;  %v3695_v30 = vld [vmem:[#allocation20_spill] sm:$0xff] }
  0x83   : > { %2040 = vmatprep.mubr.msk.bf16.mxu0 %vm532_vm10, %v1841_v46  ;;  %2100 = vmatprep.mubr.msk.bf16.mxu1 %vm532_vm10, %v1871_v29  ;;  %v1848_v46 = vcombine.low %v3695_v30, %v3694_v1  ;;  %v3696_v29 = vld [vmem:[#allocation82_spill] sm:$0xff] }
  0x84   : > { %v3707_v1 = vld [vmem:[#allocation26_spill] sm:$0xff] }
  0x8a   : > { %2041 = vmatmul.mubr.msk.bf16.gmra.mrb[4].mxu0 %vm532_vm10, %v1842_v24  ;;  %2101 = vmatmul.mubr.msk.bf16.gmra.mrb[4].mxu1 %vm532_vm10, %v1872_v39  ;;  %v3697_v24 = vld [vmem:[#allocation81_spill] sm:$0xff] }
  0x8b   : > { %2044 = vmatprep.mubr.msk.bf16.mxu0 %vm532_vm10, %v1843_v37  ;;  %2104 = vmatprep.mubr.msk.bf16.mxu1 %vm532_vm10, %v1873_v16  ;;  %v1878_v39 = vcombine.low %v3697_v24, %v3696_v29  ;;  %v3698_v37 = vld [vmem:[#allocation23_spill] sm:$0xff]  ;;  %v3699_v16 = vld [vmem:[#allocation22_spill] sm:$0xff]  ;;  %v3708_v29 = vld [vmem:[#allocation88_spill] sm:$0xff] }
  0x8c   : > { %v3709_v24 = vld [vmem:[#allocation87_spill] sm:$0xff] }
  0x92   : > { %2045 = vmatmul.mubr.msk.bf16.gmra.mrb[8].mxu0 %vm532_vm10, %v1844_v42  ;;  %2105 = vmatmul.mubr.msk.bf16.gmra.mrb[8].mxu1 %vm532_vm10, %v1874_v43  ;;  %v1849_v42 = vcombine.low %v3699_v16, %v3698_v37  ;;  %v3700_v43 = vld [vmem:[#allocation84_spill] sm:$0xff]  ;;  %v1881_v37 = vcombine.low %v3709_v24, %v3708_v29  ;;  %v3721_v29 = vld [vmem:[#allocation93_spill] sm:$0xff] }
  0x93   : > { %2048 = vmatprep.mubr.msk.bf16.mxu0 %vm532_vm10, %v1845_v45  ;;  %2108 = vmatprep.mubr.msk.bf16.mxu1 %vm532_vm10, %v1875_v28  ;;  %v3701_v45 = vld [vmem:[#allocation83_spill] sm:$0xff] }
  0x94   : > { %v1879_v28 = vcombine.low %v3701_v45, %v3700_v43  ;;  %v3713_v43 = vld [vmem:[#allocation89_spill] sm:$0xff] }
  0x9a   : > { %2049 = vmatmul.mubr.msk.bf16.gmra.mrb[12].mxu0 %vm532_vm10, %v1846_v40  ;;  %2109 = vmatmul.mubr.msk.bf16.gmra.mrb[12].mxu1 %vm532_vm10, %v1876_v33  ;;  %v3702_v40 = vld [vmem:[#allocation25_spill] sm:$0xff]  ;;  %v3703_v33 = vld [vmem:[#allocation24_spill] sm:$0xff] }
  0x9b   : > { %2052 = vmatprep.mubr.msk.bf16.mxu0 %vm532_vm10, %v1847_v36  ;;  %2112 = vmatprep.mubr.msk.bf16.mxu1 %vm532_vm10, %v1877_v0  ;;  %v1850_v27 = vcombine.low %v3703_v33, %v3702_v40  ;;  %v3704_v36 = vld [vmem:[#allocation86_spill] sm:$0xff]  ;;  %v3706_v0 = vld [vmem:[#allocation27_spill] sm:$0xff] }
  0x9c   : > { %v1880_v21 = vcombine.low %v3705_v26, %v3704_v36  ;;  %v1851_v30 = vcombine.low %v3707_v1, %v3706_v0  ;;  %v3715_v40 = vld [vmem:[#allocation30_spill] sm:$0xff]  ;;  %v3716_v36 = vld [vmem:[#allocation92_spill] sm:$0xff]  ;;  %v3717_v26 = vld [vmem:[#allocation91_spill] sm:$0xff] }
  0x9d   : > { %v1883_v0 = vcombine.low %v3717_v26, %v3716_v36  ;;  %v3729_v36 = vld [vmem:[#allocation97_spill] sm:$0xff] }
  0xa2   : > { %2053 = vmatmul.mubr.msk.bf16.gmra.mrb[16].mxu0 %vm532_vm10, %v1848_v46  ;;  %2113 = vmatmul.mubr.msk.bf16.gmra.mrb[16].mxu1 %vm532_vm10, %v1878_v39  ;;  %v3710_v46 = vld [vmem:[#allocation29_spill] sm:$0xff]  ;;  %v3711_v39 = vld [vmem:[#allocation28_spill] sm:$0xff] }
  0xa3   : > { %2056 = vmatprep.mubr.msk.bf16.mxu0 %vm532_vm10, %v1849_v42  ;;  %2116 = vmatprep.mubr.msk.bf16.mxu1 %vm532_vm10, %v1879_v28  ;;  %v1852_v16 = vcombine.low %v3711_v39, %v3710_v46  ;;  %v3712_v42 = vld [vmem:[#allocation90_spill] sm:$0xff]  ;;  %v3714_v28 = vld [vmem:[#allocation31_spill] sm:$0xff] }
  0xa4   : > { %v1882_v45 = vcombine.low %v3713_v43, %v3712_v42  ;;  %v1853_v33 = vcombine.low %v3715_v40, %v3714_v28  ;;  %v3723_v46 = vld [vmem:[#allocation34_spill] sm:$0xff]  ;;  %v3724_v42 = vld [vmem:[#allocation96_spill] sm:$0xff]  ;;  %v3725_v43 = vld [vmem:[#allocation95_spill] sm:$0xff] }
  0xa5   : > { %v1885_v28 = vcombine.low %v3725_v43, %v3724_v42  ;;  %v3737_v42 = vld [vmem:[#allocation44_spill] sm:$0xff] }
  0xaa   : > { %2057 = vmatmul.mubr.msk.bf16.gmra.mrb[20].mxu0 %vm532_vm10, %v1850_v27  ;;  %2117 = vmatmul.mubr.msk.bf16.gmra.mrb[20].mxu1 %vm532_vm10, %v1880_v21  ;;  %v3718_v27 = vld [vmem:[#allocation33_spill] sm:$0xff]  ;;  %v3719_v21 = vld [vmem:[#allocation32_spill] sm:$0xff] }
  0xab   : > { %2060 = vmatprep.mubr.msk.bf16.mxu0 %vm532_vm10, %v1851_v30  ;;  %2120 = vmatprep.mubr.msk.bf16.mxu1 %vm532_vm10, %v1881_v37  ;;  %v1854_v1 = vcombine.low %v3719_v21, %v3718_v27  ;;  %v3720_v30 = vld [vmem:[#allocation94_spill] sm:$0xff]  ;;  %v3722_v37 = vld [vmem:[#allocation35_spill] sm:$0xff] }
  0xac   : > { %v1884_v24 = vcombine.low %v3721_v29, %v3720_v30  ;;  %v1855_v39 = vcombine.low %v3723_v46, %v3722_v37  ;;  %v3731_v27 = vld [vmem:[#allocation38_spill] sm:$0xff]  ;;  %v3733_v30 = vld [vmem:[#allocation40_spill] sm:$0xff] }
  0xad   : > { %v3735_v37 = vld [vmem:[#allocation42_spill] sm:$0xff] }
  0xb2   : > { %2061 = vmatmul.mubr.msk.bf16.gmra.mrb[24].mxu0 %vm532_vm10, %v1852_v16  ;;  %2121 = vmatmul.mubr.msk.bf16.gmra.mrb[24].mxu1 %vm532_vm10, %v1882_v45  ;;  %v3726_v16 = vld [vmem:[#allocation37_spill] sm:$0xff]  ;;  %v3727_v45 = vld [vmem:[#allocation36_spill] sm:$0xff] }
  0xb3   : > { %2064 = vmatprep.mubr.msk.bf16.mxu0 %vm532_vm10, %v1853_v33  ;;  %2124 = vmatprep.mubr.msk.bf16.mxu1 %vm532_vm10, %v1883_v0  ;;  %v1856_v40 = vcombine.low %v3727_v45, %v3726_v16  ;;  %v3728_v33 = vld [vmem:[#allocation98_spill] sm:$0xff]  ;;  %v3730_v0 = vld [vmem:[#allocation39_spill] sm:$0xff] }
  0xb4   : > { %v1886_v26 = vcombine.low %v3729_v36, %v3728_v33  ;;  %v1857_v21 = vcombine.low %v3731_v27, %v3730_v0  ;;  %v3739_v16 = vld [vmem:[#allocation46_spill] sm:$0xff]  ;;  %v3741_v33 = vld [vmem:[#allocation48_spill] sm:$0xff] }
  0xb5   : > { %v3743_v0 = vld [vmem:[#allocation50_spill] sm:$0xff] }
  0xba   : > { %2065 = vmatmul.mubr.msk.bf16.gmra.mrb[28].mxu0 %vm532_vm10, %v1854_v1  ;;  %2125 = vmatmul.mubr.msk.bf16.gmra.mrb[28].mxu1 %vm532_vm10, %v1884_v24  ;;  %v3732_v1 = vld [vmem:[#allocation41_spill] sm:$0xff]  ;;  %v3734_v24 = vld [vmem:[#allocation43_spill] sm:$0xff] }
  0xbb   : > { %2068 = vmatprep.mubr.msk.bf16.mxu0 %vm532_vm10, %v1855_v39  ;;  %2128 = vmatprep.mubr.msk.bf16.mxu1 %vm532_vm10, %v1885_v28  ;;  %v1858_v29 = vcombine.low %v3733_v30, %v3732_v1  ;;  %v1859_v46 = vcombine.low %v3735_v37, %v3734_v24  ;;  %v3736_v39 = vld [vmem:[#allocation45_spill] sm:$0xff]  ;;  %v3738_v28 = vld [vmem:[#allocation47_spill] sm:$0xff]  ;;  %v3745_v1 = vld [vmem:[#allocation52_spill] sm:$0xff] }
  0xbc   : > { %v1860_v43 = vcombine.low %v3737_v42, %v3736_v39  ;;  %v1861_v45 = vcombine.low %v3739_v16, %v3738_v28  ;;  %v3747_v24 = vld [vmem:[#allocation54_spill] sm:$0xff]  ;;  %v3749_v39 = vld [vmem:[#allocation56_spill] sm:$0xff] }
  0xbd   : > { %v3751_v28 = vld [vmem:[#allocation58_spill] sm:$0xff] }
  0xc2   : > { %2069 = vmatmul.mubr.msk.bf16.gmra.mrb[32].mxu0 %vm532_vm10, %v1856_v40  ;;  %2129 = vmatmul.mubr.msk.bf16.gmra.mrb[32].mxu1 %vm532_vm10, %v1886_v26  ;;  %v3740_v40 = vld [vmem:[#allocation49_spill] sm:$0xff]  ;;  %v3742_v26 = vld [vmem:[#allocation51_spill] sm:$0xff] }
  0xc3   : > { %2072 = vmatprep.mubr.msk.bf16.mxu0 %vm532_vm10, %v1857_v21  ;;  %v1862_v36 = vcombine.low %v3741_v33, %v3740_v40  ;;  %v1863_v27 = vcombine.low %v3743_v0, %v3742_v26  ;;  %v3744_v21 = vld [vmem:[#allocation53_spill] sm:$0xff]  ;;  %v3753_v40 = vld [vmem:[#allocation60_spill] sm:$0xff] }
  0xc4   : > { %v1864_v30 = vcombine.low %v3745_v1, %v3744_v21 }
  0xca   : > { %2073 = vmatmul.mubr.msk.bf16.gmra.mrb[36].mxu0 %vm532_vm10, %v1858_v29  ;;  %v3746_v29 = vld [vmem:[#allocation55_spill] sm:$0xff] }
  0xcb   : > { %2076 = vmatprep.mubr.msk.bf16.mxu0 %vm532_vm10, %v1859_v46  ;;  %v1865_v37 = vcombine.low %v3747_v24, %v3746_v29  ;;  %v3748_v46 = vld [vmem:[#allocation57_spill] sm:$0xff] }
  0xcc   : > { %v1866_v42 = vcombine.low %v3749_v39, %v3748_v46  ;;  %v1147_v46 = vcombine.high %v2897_v61, %v2897_v61 }
  0xd2   : > { %2077 = vmatmul.mubr.msk.bf16.gmra.mrb[40].mxu0 %vm532_vm10, %v1860_v43  ;;  %v3750_v43 = vld [vmem:[#allocation59_spill] sm:$0xff] }
  0xd3   : > { %2080 = vmatprep.mubr.msk.bf16.mxu0 %vm532_vm10, %v1861_v45  ;;  %v1867_v16 = vcombine.low %v3751_v28, %v3750_v43  ;;  %v3752_v45 = vld [vmem:[#allocation61_spill] sm:$0xff]  ;;  %v3755_v43 = vld [vmem:[#allocation99_spill] sm:$0xff] }
  0xd4   : > { %v1868_v33 = vcombine.low %v3753_v40, %v3752_v45 }
  0xda   : > { %2081 = vmatmul.mubr.msk.bf16.gmra.mrb[44].mxu0 %vm532_vm10, %v1862_v36  ;;  %v2246_v36 = vmov 1966171168  }
  0xdb   : > { %2084 = vmatprep.mubr.msk.bf16.mxu0 %vm532_vm10, %v1863_v27  ;;  %v1100_v26 = vunpack.c.l.s4 %v2246_v36 }
  0xdd   : > { %v1101_v21 = vunpack.c.0.s8 %v1100_v26 }
  0xe2   : > { %2085 = vmatmul.mubr.msk.bf16.gmra.mrb[48].mxu0 %vm532_vm10, %v1864_v30 }
  0xe3   : > { %2088 = vmatprep.mubr.msk.bf16.mxu0 %vm532_vm10, %v1865_v37 }
  0xea   : > { %2089 = vmatmul.mubr.msk.bf16.gmra.mrb[52].mxu0 %vm532_vm10, %v1866_v42  ;;  %v3754_v42 = vld [vmem:[#allocation101_spill] sm:$0xff] }
  0xeb   : > { %2092 = vmatprep.mubr.msk.bf16.mxu0 %vm532_vm10, %v1867_v16  ;;  %v1936_v28 = vcombine.high %v3755_v43, %v3754_v42  ;;  %v3058_v16 = vsub.s32 %v1101_v21, %v3647_v38 }
  0xed   : > { %1638 = vmatprep.mubr.bf16.mxu1 %v1936_v28  ;;  %v1161_v45 = vrot.slane %v1147_v46, %v3058_v16  ;;  %v1105_v8 = vrot.slane %v2895_v60, %v3058_v16  ;;  %v1112_v60 = vrot.slane %v1098_v17, %v3058_v16 }
  0xef   : > { %v1163_v5 = vcombine.high %v1161_v45, %v1161_v45  ;;  %v1177_v28 = vrot.slane %v1161_v45, %v3058_v16  ;;  %v1113_v15 = vcombine.high %v1105_v8, %v1105_v8  ;;  %v1121_v48 = vrot.slane %v1105_v8, %v3058_v16 }
  0xf0   : > { %v1114_v62 = vcombine.high %v1112_v60, %v1112_v60 }
  0xf1   : > { %v1191_v46 = vrot.slane %v1163_v5, %v3058_v16  ;;  %v1193_v10 = vcombine.high %v1177_v28, %v1177_v28  ;;  %v3103_v41 = vrot.slane %v1177_v28, %v2884_v44  ;;  %v1135_v53 = vrot.slane %v1113_v15, %v3058_v16 }
  0xf2   : > { %2093 = vmatmul.mubr.msk.bf16.gmra.mrb[56].mxu0 %vm532_vm10, %v1868_v33  ;;  %v1143_v56 = vcombine.high %v1121_v48, %v1121_v48 }
  0xf3   : > { %v1195_v45 = vcombine.high %v1191_v46, %v1191_v46  ;;  %v3100_v38 = vrot.slane %v1193_v10, %v2884_v44  ;;  %v3110_v51 = vrot.slane %v1191_v46, %v2884_v44 }
  0xf4   : > { %v3135_v34 = vrot.slane %v1143_v56, %v2884_v44  ;;  %v1142_v56 = vrot.slane %v1114_v62, %v3058_v16 }
  0xf5   : > { %v3107_v49 = vrot.slane %v1195_v45, %v2884_v44 }
 0x155   : > { %v3045_v0 = vpop.f32.mrb[0].mxu0  ;;  %v2098_v27 = vpop.f32.mrb[0].mxu1 }
 0x156   : > { %v3047_v1 = vpop.f32.mrb[1].mxu0  ;;  %v951_v30 = vpop.f32.mrb[1].mxu1 }
 0x157   : > { %v3049_v29 = vpop.f32.mrb[2].mxu0  ;;  %v2099_v24 = vpop.f32.mrb[2].mxu1 }
 0x158   : > { %v3051_v37 = vpop.f32.mrb[3].mxu0  ;;  %v954_v39 = vpop.f32.mrb[3].mxu1 }
 0x15d   : > { %v3061_v40 = vpop.f32.mrb[4].mxu0  ;;  %v3063_v33 = vpop.f32.mrb[4].mxu1 }
 0x15e   : > { %v3065_v36 = vpop.f32.mrb[5].mxu0  ;;  %v3067_v26 = vpop.f32.mrb[5].mxu1 }
 0x15f   : > { %v3069_v2 = vpop.f32.mrb[6].mxu0  ;;  %v3071_v3 = vpop.f32.mrb[6].mxu1 }
 0x160   : > { %v3073_v4 = vpop.f32.mrb[7].mxu0  ;;  %v3075_v21 = vpop.f32.mrb[7].mxu1 }
 0x165   : > { %v3079_v6 = vpop.f32.mrb[8].mxu0  ;;  %v3081_v7 = vpop.f32.mrb[8].mxu1 }
 0x166   : > { %v3085_v9 = vpop.f32.mrb[9].mxu0  ;;  %v3087_v11 = vpop.f32.mrb[9].mxu1 }
 0x167   : > { %v3089_v12 = vpop.f32.mrb[10].mxu0  ;;  %v3091_v13 = vpop.f32.mrb[10].mxu1 }
 0x168   : > { %3756 = vst [vmem:[#allocation121_spill] sm:$0xff] %v3089_v12  ;;  %v3093_v14 = vpop.f32.mrb[11].mxu0  ;;  %v3095_v5 = vpop.f32.mrb[11].mxu1 }
 0x169   : > { %3757 = vst [vmem:[#allocation122_spill] sm:$0xff] %v3093_v14 }
 0x16d   : > { %v2050_v50 = vpop.f32.mrb[12].mxu0  ;;  %v3112_v52 = vpop.f32.mrb[12].mxu1 }
 0x16e   : > { %v1468_v10 = vmul.f32 %v2050_v50, %v3100_v38  ;;  %v759_v54 = vpop.f32.mrb[13].mxu0  ;;  %v3117_v28 = vpop.f32.mrb[13].mxu1  ;;  %v1145_v50 = vcombine.high %v1135_v53, %v1135_v53 }
 0x16f   : > { %v1466_v8 = vmul.f32 %v3103_v41, %v759_v54  ;;  %v2051_v55 = vpop.f32.mrb[14].mxu0  ;;  %v3120_v45 = vpop.f32.mrb[14].mxu1 }
 0x170   : > { %v1469_v46 = vmul.f32 %v2051_v55, %v3107_v49  ;;  %v3123_v57 = vmul.f32 %v2098_v27, %v1468_v10  ;;  %v762_v58 = vpop.f32.mrb[15].mxu0  ;;  %v3125_v59 = vpop.f32.mrb[15].mxu1  ;;  %v1128_v55 = vrot.slane %v1112_v60, %v3058_v16  ;;  %v3141_v10 = vrot.slane %v1121_v48, %v2884_v44 }
 0x171   : > { %v1467_v15 = vmul.f32 %v3110_v51, %v762_v58  ;;  %v3128_v17 = vmul.f32 %v1466_v8, %v951_v30  ;;  %v3157_v48 = vrot.slane %v1135_v53, %v2884_v44  ;;  %v1146_v53 = vcombine.high %v1142_v56, %v1142_v56 }
 0x172   : > { %3758 = vst [vmem:[#allocation123_spill] sm:$0xff] %v3123_v57  ;;  %v3130_v63 = vmul.f32 %v2099_v24, %v1469_v46  ;;  %v3148_v24 = vrot.slane %v1145_v50, %v2884_v44  ;;  %v1144_v50 = vcombine.high %v1128_v55, %v1128_v55 }
 0x173   : > { %3759 = vst [vmem:[#allocation124_spill] sm:$0xff] %v3128_v17  ;;  %v3132_v54 = vmul.f32 %v1467_v15, %v954_v39  ;;  %v1154_v39 = vrot.slane %v2897_v61, %v3058_v16 }
 0x174   : > { %3760 = vst [vmem:[#allocation125_spill] sm:$0xff] %v3130_v63  ;;  %v3175_v18 = vrot.slane %v1144_v50, %v2884_v44 }
 0x175   : > { %3761 = vst [vmem:[#allocation126_spill] sm:$0xff] %v3132_v54  ;;  %v2054_v30 = vpop.f32.mrb[16].mxu0  ;;  %v3145_v8 = vpop.f32.mrb[16].mxu1  ;;  %v1162_v32 = vcombine.high %v1154_v39, %v1154_v39 }
 0x176   : > { %v1472_v60 = vmul.f32 %v2054_v30, %v3135_v34  ;;  %v775_v46 = vpop.f32.mrb[17].mxu0  ;;  %v3154_v15 = vpop.f32.mrb[17].mxu1 }
 0x177   : > { %v1470_v27 = vmul.f32 %v3141_v10, %v775_v46  ;;  %v2055_v58 = vpop.f32.mrb[18].mxu0  ;;  %v3160_v31 = vpop.f32.mrb[18].mxu1 }
 0x178   : > { %v1473_v25 = vmul.f32 %v2055_v58, %v3148_v24  ;;  %v3164_v62 = vmul.f32 %v3063_v33, %v1472_v60  ;;  %v778_v61 = vpop.f32.mrb[19].mxu0  ;;  %v3166_v22 = vpop.f32.mrb[19].mxu1  ;;  %v1170_v33 = vrot.slane %v1154_v39, %v3058_v16  ;;  %v3181_v60 = vrot.slane %v1128_v55, %v2884_v44 }
 0x179   : > { %v1471_v30 = vmul.f32 %v3157_v48, %v778_v61  ;;  %v1518_v20 = vmul.f32 %v1470_v27, %v3067_v26  ;;  %v3193_v39 = vrot.slane %v1142_v56, %v2884_v44 }
 0x17a   : > { %v3171_v46 = vmul.f32 %v3071_v3, %v1473_v25  ;;  %v3186_v3 = vrot.slane %v1146_v53, %v2884_v44  ;;  %v1184_v25 = vrot.slane %v1162_v32, %v3058_v16 }
 0x17b   : > { %v1519_v47 = vmul.f32 %v1471_v30, %v3075_v21 }
 0x17c   : > { %v1194_v63 = vcombine.high %v1184_v25, %v1184_v25 }
 0x17d   : > { %v1558_v61 = vpack.c.bf16 %v1519_v47, %v1518_v20  ;;  %v2058_v26 = vpop.f32.mrb[20].mxu0  ;;  %v3183_v27 = vpop.f32.mrb[20].mxu1  ;;  %v1192_v20 = vcombine.high %v1170_v33, %v1170_v33 }
 0x17e   : > { %v1476_v21 = vmul.f32 %v2058_v26, %v3175_v18  ;;  %v791_v50 = vpop.f32.mrb[21].mxu0  ;;  %v3190_v30 = vpop.f32.mrb[21].mxu1 }
 0x17f   : > { %v1474_v55 = vmul.f32 %v3181_v60, %v791_v50  ;;  %v2059_v58 = vpop.f32.mrb[22].mxu0  ;;  %1992 = vmatprep.subr.bf16.mxu1 %v1558_v61  ;;  %v3196_v47 = vpop.f32.mrb[22].mxu1 }
 0x180   : > { %v1477_v53 = vmul.f32 %v2059_v58, %v3186_v3  ;;  %v3200_v19 = vmul.f32 %v3081_v7, %v1476_v21  ;;  %v794_v32 = vpop.f32.mrb[23].mxu0  ;;  %v3202_v26 = vpop.f32.mrb[23].mxu1  ;;  %v3215_v58 = vrot.slane %v1192_v20, %v2884_v44  ;;  %v1203_v21 = vrot.slane %v2899_v35, %v3058_v16 }
 0x181   : > { %v1475_v57 = vmul.f32 %v3193_v39, %v794_v32  ;;  %v3206_v56 = vmul.f32 %v1474_v55, %v3087_v11  ;;  %v3222_v32 = vrot.slane %v1170_v33, %v2884_v44  ;;  %v3235_v7 = vrot.slane %v1184_v25, %v2884_v44 }
 0x182   : > { %3762 = vst [vmem:[#allocation127_spill] sm:$0xff] %v3200_v19  ;;  %v3209_v50 = vmul.f32 %v3091_v13, %v1477_v53  ;;  %v1196_v11 = vcombine.high %v2899_v35, %v2899_v35  ;;  %v1211_v54 = vcombine.high %v1203_v21, %v1203_v21  ;;  %v1219_v35 = vrot.slane %v1203_v21, %v3058_v16 }
 0x183   : > { %v3212_v61 = vmul.f32 %v1475_v57, %v3095_v5  ;;  %v3229_v57 = vrot.slane %v1194_v63, %v2884_v44  ;;  %3764 = vst [vmem:[#allocation129_spill] sm:$0xff] %v3235_v7 }
 0x184   : > { %3763 = vst [vmem:[#allocation128_spill] sm:$0xff] %v3209_v50  ;;  %v1241_v21 = vcombine.high %v1219_v35, %v1219_v35 }
 0x185   : > { %v2062_v13 = vpop.f32.mrb[24].mxu0  ;;  %v3226_v55 = vpop.f32.mrb[24].mxu1 }
 0x186   : > { %v1480_v5 = vmul.f32 %v2062_v13, %v3215_v58  ;;  %v807_v20 = vpop.f32.mrb[25].mxu0  ;;  %v3232_v53 = vpop.f32.mrb[25].mxu1 }
 0x187   : > { %v1478_v33 = vmul.f32 %v3222_v32, %v807_v20  ;;  %v2063_v43 = vpop.f32.mrb[26].mxu0  ;;  %v3240_v42 = vpop.f32.mrb[26].mxu1 }
 0x188   : > { %v1481_v17 = vmul.f32 %v2063_v43, %v3229_v57  ;;  %v3244_v63 = vmul.f32 %v3112_v52, %v1480_v5  ;;  %v810_v13 = vpop.f32.mrb[27].mxu0  ;;  %v3246_v14 = vpop.f32.mrb[27].mxu1  ;;  %v1210_v52 = vrot.slane %v1196_v11, %v3058_v16  ;;  %v1233_v5 = vrot.slane %v1211_v54, %v3058_v16 }
 0x189   : > { %v1479_v25 = vmul.f32 %v3235_v7, %v810_v13  ;;  %v3250_v19 = vmul.f32 %v1478_v33, %v3117_v28 }
 0x18a   : > { %3765 = vst [vmem:[#allocation130_spill] sm:$0xff] %v3244_v63  ;;  %v3253_v20 = vmul.f32 %v3120_v45, %v1481_v17  ;;  %v1243_v63 = vcombine.high %v1233_v5, %v1233_v5 }
 0x18b   : > { %3766 = vst [vmem:[#allocation131_spill] sm:$0xff] %v3250_v19  ;;  %v3257_v50 = vmul.f32 %v1479_v25, %v3125_v59  ;;  %v1212_v25 = vcombine.high %v1210_v52, %v1210_v52  ;;  %v1226_v19 = vrot.slane %v1210_v52, %v3058_v16  ;;  %v1365_v52 = vrot.slane %v1233_v5, %v2884_v44 }
 0x18c   : > { %3767 = vst [vmem:[#allocation132_spill] sm:$0xff] %v3253_v20  ;;  %v1245_v5 = vcombine.high %v2901_v23, %v2901_v23 }
 0x18d   : > { %3768 = vst [vmem:[#allocation133_spill] sm:$0xff] %v3257_v50  ;;  %v2066_v28 = vpop.f32.mrb[28].mxu0  ;;  %v3265_v33 = vpop.f32.mrb[28].mxu1 }
 0x18e   : > { %v1484_v45 = vmul.f32 %v2066_v28, %v3100_v38  ;;  %v823_v17 = vpop.f32.mrb[29].mxu0  ;;  %v3268_v7 = vpop.f32.mrb[29].mxu1 }
 0x18f   : > { %v1482_v59 = vmul.f32 %v3103_v41, %v823_v17  ;;  %v2067_v11 = vpop.f32.mrb[30].mxu0  ;;  %v3271_v12 = vpop.f32.mrb[30].mxu1  ;;  %v1369_v17 = vrot.slane %v1241_v21, %v2884_v44 }
 0x190   : > { %v1485_v54 = vmul.f32 %v2067_v11, %v3107_v49  ;;  %v3275_v43 = vmul.f32 %v3145_v8, %v1484_v45  ;;  %v826_v13 = vpop.f32.mrb[31].mxu0  ;;  %v3277_v20 = vpop.f32.mrb[31].mxu1  ;;  %v1361_v8 = vrot.slane %v1219_v35, %v2884_v44  ;;  %v1240_v45 = vrot.slane %v1212_v25, %v3058_v16 }
 0x191   : > { %v1483_v38 = vmul.f32 %v3110_v51, %v826_v13  ;;  %v3281_v28 = vmul.f32 %v1482_v59, %v3154_v15  ;;  %v1373_v15 = vrot.slane %v1243_v63, %v2884_v44  ;;  %v1242_v11 = vcombine.high %v1226_v19, %v1226_v19 }
 0x192   : > { %3769 = vst [vmem:[#allocation134_spill] sm:$0xff] %v3275_v43  ;;  %v3284_v41 = vmul.f32 %v3160_v31, %v1485_v54  ;;  %v1252_v31 = vrot.slane %v2901_v23, %v3058_v16  ;;  %v1244_v51 = vcombine.high %v1240_v45, %v1240_v45 }
 0x193   : > { %3770 = vst [vmem:[#allocation135_spill] sm:$0xff] %v3281_v28  ;;  %v3289_v49 = vmul.f32 %v1483_v38, %v3166_v22 }
 0x194   : > { %3771 = vst [vmem:[#allocation136_spill] sm:$0xff] %v3284_v41  ;;  %v1260_v13 = vcombine.high %v1252_v31, %v1252_v31 }
 0x195   : > { %3772 = vst [vmem:[#allocation137_spill] sm:$0xff] %v3289_v49  ;;  %v2070_v21 = vpop.f32.mrb[32].mxu0  ;;  %v3301_v22 = vpop.f32.mrb[32].mxu1 }
 0x196   : > { %v1488_v59 = vmul.f32 %v2070_v21, %v1369_v17  ;;  %v839_v35 = vpop.f32.mrb[33].mxu0  ;;  %v3303_v25 = vpop.f32.mrb[33].mxu1  ;;  %v1282_v23 = vrot.slane %v1260_v13, %v3058_v16 }
 0x197   : > { %v1486_v54 = vmul.f32 %v1361_v8, %v839_v35  ;;  %v2071_v38 = vpop.f32.mrb[34].mxu0  ;;  %v3305_v63 = vpop.f32.mrb[34].mxu1  ;;  %v1385_v8 = vrot.slane %v1242_v11, %v2884_v44  ;;  %v1268_v35 = vrot.slane %v1252_v31, %v3058_v16 }
 0x198   : > { %v1489_v43 = vmul.f32 %v2071_v38, %v1373_v15  ;;  %v1536_v41 = vmul.f32 %v3183_v27, %v1488_v59  ;;  %v842_v50 = vpop.f32.mrb[35].mxu0  ;;  %v3310_v28 = vpop.f32.mrb[35].mxu1  ;;  %v1377_v27 = vrot.slane %v1226_v19, %v2884_v44  ;;  %v1389_v38 = vrot.slane %v1244_v51, %v2884_v44 }
 0x199   : > { %v1487_v17 = vmul.f32 %v1365_v52, %v842_v50  ;;  %v1534_v21 = vmul.f32 %v1486_v54, %v3190_v30  ;;  %v1259_v50 = vrot.slane %v1245_v5, %v3058_v16  ;;  %v1290_v31 = vcombine.high %v1268_v35, %v1268_v35 }
 0x19a   : > { %v1537_v49 = vmul.f32 %v3196_v47, %v1489_v43  ;;  %v1381_v47 = vrot.slane %v1240_v45, %v2884_v44 }
 0x19b   : > { %v1535_v15 = vmul.f32 %v1487_v17, %v3202_v26  ;;  %v1261_v51 = vcombine.high %v1259_v50, %v1259_v50  ;;  %v1275_v45 = vrot.slane %v1259_v50, %v3058_v16 }
 0x19c   : > { %v3318_v59 = vpack.c.bf16 %v1537_v49, %v1536_v41  ;;  %v1292_v49 = vcombine.high %v1282_v23, %v1282_v23 }
 0x19d   : > { %v3323_v52 = vpack.c.bf16 %v1535_v15, %v1534_v21  ;;  %v2074_v30 = vpop.f32.mrb[36].mxu0  ;;  %v1401_v21 = vrot.slane %v1290_v31, %v2884_v44  ;;  %v1393_v15 = vrot.slane %v1268_v35, %v2884_v44 }
 0x19e   : > { %3773 = vst [vmem:[#allocation138_spill] sm:$0xff] %v3318_v59  ;;  %v1492_v43 = vmul.f32 %v2074_v30, %v1385_v8  ;;  %v855_v11 = vpop.f32.mrb[37].mxu0 }
 0x19f   : > { %v1490_v54 = vmul.f32 %v1377_v27, %v855_v11  ;;  %v2075_v26 = vpop.f32.mrb[38].mxu0  ;;  %v1291_v11 = vcombine.high %v1275_v45, %v1275_v45 }
 0x1a0   : > { %v1493_v17 = vmul.f32 %v2075_v26, %v1389_v38  ;;  %v1540_v19 = vmul.f32 %v3226_v55, %v1492_v43  ;;  %v858_v41 = vpop.f32.mrb[39].mxu0  ;;  %v1405_v55 = vrot.slane %v1292_v49, %v2884_v44  ;;  %v1289_v38 = vrot.slane %v1261_v51, %v3058_v16 }
 0x1a1   : > { %v1491_v59 = vmul.f32 %v1381_v47, %v858_v41  ;;  %v1538_v13 = vmul.f32 %v1490_v54, %v3232_v53  ;;  %v1397_v53 = vrot.slane %v1282_v23, %v2884_v44  ;;  %v1409_v23 = vrot.slane %v1275_v45, %v2884_v44 }
 0x1a2   : > { %v1541_v5 = vmul.f32 %v3240_v42, %v1493_v17 }
 0x1a3   : > { %v1539_v8 = vmul.f32 %v1491_v59, %v3246_v14  ;;  %v1293_v59 = vcombine.high %v1289_v38, %v1289_v38 }
 0x1a4   : > { %v3333_v27 = vpack.c.bf16 %v1541_v5, %v1540_v19  ;;  %v1417_v19 = vrot.slane %v1291_v11, %v2884_v44  ;;  %v1413_v5 = vrot.slane %v1289_v38, %v2884_v44  ;;  %v1454_v38 = vmul.f32 %v3141_v10, %v3047_v1 }
 0x1a5   : > { %v3337_v30 = vpack.c.bf16 %v1539_v8, %v1538_v13  ;;  %v2078_v47 = vpop.f32.mrb[40].mxu0  ;;  %v1421_v51 = vrot.slane %v1293_v59, %v2884_v44  ;;  %v1460_v1 = vmul.f32 %v3061_v40, %v3175_v18  ;;  %v1458_v10 = vmul.f32 %v3181_v60, %v3065_v36 }
 0x1a6   : > { %v1496_v42 = vmul.f32 %v2078_v47, %v1401_v21  ;;  %v871_v43 = vpop.f32.mrb[41].mxu0  ;;  %v3775_v60 = vpack.c.bf16 %v3212_v61, %v3206_v56  ;;  %v3780_v56 = vld [vmem:[#allocation122_spill] sm:$0xff]  ;;  %v3781_v61 = vld [vmem:[#allocation129_spill] sm:$0xff] }
 0x1a7   : > { %v1494_v31 = vmul.f32 %v1393_v15, %v871_v43  ;;  %v2079_v50 = vpop.f32.mrb[42].mxu0  ;;  %v1456_v43 = vmul.f32 %v3045_v0, %v3135_v34 }
 0x1a8   : > { %v1497_v54 = vmul.f32 %v2079_v50, %v1405_v55  ;;  %v1544_v14 = vmul.f32 %v3265_v33, %v1496_v42  ;;  %v874_v35 = vpop.f32.mrb[43].mxu0 }
 0x1a9   : > { %v1495_v26 = vmul.f32 %v1397_v53, %v874_v35  ;;  %v1542_v17 = vmul.f32 %v1494_v31, %v3268_v7 }
 0x1aa   : > { %v1545_v16 = vmul.f32 %v3271_v12, %v1497_v54 }
 0x1ab   : > { %v1543_v41 = vmul.f32 %v1495_v26, %v3277_v20 }
 0x1ac   : > { %v3346_v49 = vpack.c.bf16 %v1545_v16, %v1544_v14  ;;  %v1459_v16 = vmul.f32 %v3193_v39, %v3073_v4  ;;  %v3776_v4 = vld [vmem:[#allocation121_spill] sm:$0xff] }
 0x1ad   : > { %v3349_v13 = vpack.c.bf16 %v1543_v41, %v1542_v17  ;;  %v2082_v33 = vpop.f32.mrb[44].mxu0  ;;  %v1465_v39 = vmul.f32 %v3776_v4, %v3229_v57  ;;  %v2247_v4 = vmov 0  }
 0x1ae   : > { %v1500_v21 = vmul.f32 %v2082_v33, %v1417_v19  ;;  %v887_v8 = vpop.f32.mrb[45].mxu0 }
 0x1af   : > { %v1498_v7 = vmul.f32 %v1409_v23, %v887_v8  ;;  %v2083_v15 = vpop.f32.mrb[46].mxu0 }
 0x1b0   : > { %v1501_v12 = vmul.f32 %v2083_v15, %v1421_v51  ;;  %v1548_v55 = vmul.f32 %v3301_v22, %v1500_v21  ;;  %v890_v47 = vpop.f32.mrb[47].mxu0  ;;  %v1457_v22 = vmul.f32 %v3049_v29, %v3148_v24  ;;  %v1461_v29 = vmul.f32 %v3069_v2, %v3186_v3  ;;  %v3778_v21 = vld [vmem:[#allocation127_spill] sm:$0xff] }
 0x1b1   : > { %v1499_v20 = vmul.f32 %v1413_v5, %v890_v47  ;;  %v1546_v45 = vmul.f32 %v1498_v7, %v3303_v25  ;;  %v1464_v3 = vmul.f32 %v3079_v6, %v3215_v58  ;;  %v3777_v5 = vld [vmem:[#allocation128_spill] sm:$0xff]  ;;  %v1463_v7 = vmul.f32 %v3781_v61, %v3780_v56  ;;  %v3783_v47 = vld [vmem:[#allocation131_spill] sm:$0xff] }
 0x1b2   : > { %v1549_v53 = vmul.f32 %v3305_v63, %v1501_v12  ;;  %v1455_v63 = vmul.f32 %v3157_v48, %v3051_v37  ;;  %v3774_v48 = vpack.c.bf16 %v3171_v46, %v3164_v62  ;;  %v1462_v62 = vmul.f32 %v3222_v32, %v3085_v9  ;;  %v3782_v32 = vld [vmem:[#allocation133_spill] sm:$0xff]  ;;  %v3811_v56 = vld [vmem:[#allocation108_spill] sm:$0xff] }
 0x1b3   : > { %v1547_v42 = vmul.f32 %v1499_v20, %v3310_v28  ;;  %v3779_v8 = vpack.c.bf16 %v3777_v5, %v3778_v21  ;;  %v3784_v20 = vpack.c.bf16 %v3782_v32, %v3783_v47  ;;  %v3810_v21 = vld [vmem:[#allocation112_spill] sm:$0xff]  ;;  %v1731_v61 = vrot.slane %v3811_v56, 6 }
 0x1b4   : > { %v3358_v11 = vpack.c.bf16 %v1549_v53, %v1548_v55  ;;  %v3786_v53 = vld [vmem:[#allocation130_spill] sm:$0xff] }
 0x1b5   : > { %v3362_v31 = vpack.c.bf16 %v1547_v42, %v1546_v45  ;;  %v2086_v50 = vpop.f32.mrb[48].mxu0  ;;  %v3785_v45 = vld [vmem:[#allocation132_spill] sm:$0xff] }
 0x1b6   : > { %v1504_v54 = vmul.f32 %v2086_v50, %v1456_v43  ;;  %v903_v25 = vpop.f32.mrb[49].mxu0  ;;  %v3787_v42 = vpack.c.bf16 %v3785_v45, %v3786_v53  ;;  %v3788_v43 = vld [vmem:[#allocation137_spill] sm:$0xff] }
 0x1b7   : > { %v1502_v28 = vmul.f32 %v1454_v38, %v903_v25  ;;  %v2087_v14 = vpop.f32.mrb[50].mxu0  ;;  %v3789_v38 = vld [vmem:[#allocation135_spill] sm:$0xff] }
 0x1b8   : > { %v1505_v35 = vmul.f32 %v2087_v14, %v1457_v22  ;;  %v906_v34 = vpop.f32.mrb[51].mxu0  ;;  %v3790_v50 = vpack.c.bf16 %v3788_v43, %v3789_v38  ;;  %v3791_v22 = vld [vmem:[#allocation126_spill] sm:$0xff] }
 0x1b9   : > { %v1503_v0 = vmul.f32 %v1455_v63, %v906_v34  ;;  %v3794_v63 = vld [vmem:[#allocation136_spill] sm:$0xff]  ;;  %v3798_v34 = vld [vmem:[#allocation99_spill] sm:$0xff] }
 0x1ba   : > { %v1551_v59 = vpack.c.bf16 %v1505_v35, %v1504_v54  ;;  %v3792_v54 = vld [vmem:[#allocation124_spill] sm:$0xff]  ;;  %v3797_v35 = vld [vmem:[#allocation101_spill] sm:$0xff] }
 0x1bb   : > { %v1550_v26 = vpack.c.bf16 %v1503_v0, %v1502_v28  ;;  %v3793_v25 = vpack.c.bf16 %v3791_v22, %v3792_v54  ;;  %v3795_v28 = vld [vmem:[#allocation134_spill] sm:$0xff]  ;;  %v1935_v0 = vcombine.low %v3798_v34, %v3797_v35 }
 0x1bc   : > { %v3796_v14 = vpack.c.bf16 %v3794_v63, %v3795_v28 }
 0x1bd   : > { %v2090_v17 = vpop.f32.mrb[52].mxu0  ;;  %1993 = vmatpush3.bf16.msra.mxu1 %v1550_v26  ;;  %v3800_v26 = vld [vmem:[#allocation123_spill] sm:$0xff] }
 0x1be   : > { %v1508_v24 = vmul.f32 %v2090_v17, %v1460_v1  ;;  %v919_v37 = vpop.f32.mrb[53].mxu0  ;;  %1994 = vmatprep.subr.bf16.mxu1 %v3774_v48  ;;  %v3803_v17 = vld [vmem:[#allocation103_spill] sm:$0xff]  ;;  %v3805_v48 = vld [vmem:[#allocation102_spill] sm:$0xff] }
 0x1bf   : > { %v1506_v19 = vmul.f32 %v1458_v10, %v919_v37  ;;  %v2091_v41 = vpop.f32.mrb[54].mxu0  ;;  %v3802_v10 = vld [vmem:[#allocation105_spill] sm:$0xff] }
 0x1c0   : > { %v1509_v18 = vmul.f32 %v2091_v41, %v1461_v29  ;;  %v922_v40 = vpop.f32.mrb[55].mxu0  ;;  %v1939_v29 = vcombine.high %v3803_v17, %v3802_v10  ;;  %v1938_v37 = vcombine.low %v3803_v17, %v3802_v10 }
 0x1c1   : > { %v1507_v23 = vmul.f32 %v1459_v16, %v922_v40  ;;  %1995 = vmatpush3.bf16.msra.mxu1 %v1551_v59  ;;  %v3799_v59 = vld [vmem:[#allocation125_spill] sm:$0xff]  ;;  %v3806_v16 = vld [vmem:[#allocation100_spill] sm:$0xff] }
 0x1c2   : > { %v1553_v36 = vpack.c.bf16 %v1509_v18, %v1508_v24  ;;  %1996 = vmatprep.subr.bf16.mxu1 %v3775_v60  ;;  %v3801_v1 = vpack.c.bf16 %v3799_v59, %v3800_v26  ;;  %v3804_v24 = vld [vmem:[#allocation138_spill] sm:$0xff] }
 0x1c3   : > { %v1552_v2 = vpack.c.bf16 %v1507_v23, %v1506_v19  ;;  %v1937_v19 = vcombine.low %v3806_v16, %v3805_v48 }
 0x1c5   : > { %v2094_v46 = vpop.f32.mrb[56].mxu0  ;;  %1997 = vmatpush3.bf16.msra.mxu1 %v1552_v2 }
 0x1c6   : > { %v1512_v51 = vmul.f32 %v2094_v46, %v1464_v3  ;;  %v935_v33 = vpop.f32.mrb[57].mxu0  ;;  %1998 = vmatprep.subr.bf16.mxu1 %v3779_v8  ;;  %v3809_v46 = vld [vmem:[#allocation120_spill] sm:$0xff]  ;;  %v1730_v8 = vrot.slane %v3810_v21, 6 }
 0x1c7   : > { %v1510_v15 = vmul.f32 %v1462_v62, %v935_v33  ;;  %v2095_v12 = vpop.f32.mrb[58].mxu0  ;;  %vm231_vm11 = vcmp.ge.f32.partialorder %v3809_v46, -1.0  ;;  %vm232_vm12 = vcmp.le.f32.partialorder %v3809_v46, 1.0 }
 0x1c8   : > { %v1513_v6 = vmul.f32 %v2095_v12, %v1465_v39  ;;  %v938_v58 = vpop.f32.mrb[59].mxu0  ;;  %vm233_vm13 = vmand %vm231_vm11, %vm232_vm12  ;;  %v1732_v47 = vsel %vm199_vm3, %v1730_v8, %v1731_v61 }
 0x1c9   : > { %v1511_v55 = vmul.f32 %v1463_v7, %v938_v58  ;;  %1999 = vmatpush3.bf16.msra.mxu1 %v1553_v36  ;;  %v1753_v58 = vrot.slane %v3811_v56, 5 }
 0x1ca   : > { %v1555_v9 = vpack.c.bf16 %v1513_v6, %v1512_v51  ;;  %2000 = vmatprep.subr.bf16.mxu1 %v3784_v20  ;;  %v238_v51 = vsel %vm232_vm12, 1, %v2247_v4  ;;  %v1752_v6 = vrot.slane %v3810_v21, 5 }
 0x1cb   : > { %v1554_v57 = vpack.c.bf16 %v1511_v55, %v1510_v15  ;;  %v239_v33 = vrot.slane %v238_v51, 1  ;;  %v245_v7 = vrot.slane %v238_v51, 2  ;;  %v1708_v55 = vrot.slane %v3810_v21, 7 }
 0x1cd   : > { %2001 = vmatpush3.bf16.msra.mxu1 %v1554_v57  ;;  %vm240_vm2 = vcmp.ne.s32.totalorder %v239_v33, 0  ;;  %vm246_vm10 = vcmp.ne.s32.totalorder %v245_v7, 0 }
 0x1ce   : > { %2002 = vmatprep.subr.bf16.mxu1 %v3787_v42  ;;  %v1754_v42 = vsel %vm132_vm0, %v1752_v6, %v1753_v58 }
 0x1d1   : > { %2003 = vmatpush3.bf16.msra.mxu1 %v1555_v9  ;;  %v1709_v9 = vrot.slane %v3811_v56, 7 }
 0x1d2   : > { %2004 = vmatprep.subr.bf16.mxu1 %v3790_v50 }
 0x1d3   : > { %v1710_v54 = vsel %vm197_vm1, %v1708_v55, %v1709_v9 }
 0x1d5   : > { %2005 = vmatpush3.bf16.msra.mxu1 %v3793_v25 }
 0x1d6   : > { %2006 = vmatprep.subr.bf16.mxu1 %v3796_v14 }
 0x1d9   : > { %2007 = vmatpush3.bf16.msra.mxu1 %v3801_v1 }
 0x1da   : > { %2132 = vmatprep.subr.bf16.mxu1 %v3323_v52 }
 0x1dc   : > { %1639 = vmatmul.mubr.bf16.vlgmr.msra.gmra.mrb[36].mxu1 %v1935_v0 }
 0x1dd   : > { %2133 = vmatpush3.bf16.msra.mxu1 %v3323_v52  ;;  %1646 = vmatprep.mubr.bf16.mxu1 %v1939_v29  ;;  %v3807_v52 = vld [vmem:[#allocation107_spill] sm:$0xff] }
 0x1de   : > { %2134 = vmatprep.subr.bf16.mxu1 %v3804_v24 }
 0x1e1   : > { %2135 = vmatpush3.bf16.msra.mxu1 %v3804_v24 }
 0x1e2   : > { %2136 = vmatprep.subr.bf16.mxu1 %v3337_v30 }
 0x1e4   : > { %1647 = vmatmul.mubr.bf16.gmra.mrb[40].mxu1 %v1938_v37 }
 0x1e5   : > { %2137 = vmatpush3.bf16.msra.mxu1 %v3337_v30  ;;  %2148 = vmatprep.mubr.bf16.mxu1 %v1937_v19  ;;  %v3808_v30 = vld [vmem:[#allocation104_spill] sm:$0xff]  ;;  %v3816_v19 = vld [vmem:[#allocation114_spill] sm:$0xff] }
 0x1e6   : > { %2138 = vmatprep.subr.bf16.mxu1 %v3333_v27  ;;  %v1940_v41 = vcombine.low %v3808_v30, %v3807_v52 }
 0x1e9   : > { %2139 = vmatpush3.bf16.msra.mxu1 %v3333_v27 }
 0x1ea   : > { %2140 = vmatprep.subr.bf16.mxu1 %v3349_v13 }
 0x1ed   : > { %2141 = vmatpush3.bf16.msra.mxu1 %v3349_v13 }
 0x1ee   : > { %2142 = vmatprep.subr.bf16.mxu1 %v3346_v49 }
 0x1f1   : > { %2143 = vmatpush3.bf16.msra.mxu1 %v3346_v49 }
 0x1f2   : > { %2144 = vmatprep.subr.bf16.mxu1 %v3362_v31 }
 0x1f5   : > { %2145 = vmatpush3.bf16.msra.mxu1 %v3362_v31 }
 0x1f6   : > { %2146 = vmatprep.subr.bf16.mxu1 %v3358_v11 }
 0x1f9   : > { %2147 = vmatpush3.bf16.msra.mxu1 %v3358_v11  ;;  %v234_v11 = vsel %vm231_vm11, 1, %v2247_v4 }
 0x1fa   : > { %v235_v39 = vrot.slane %v234_v11, 1  ;;  %v242_v5 = vrot.slane %v234_v11, 2 }
 0x1fc   : > { %2149 = vmatmul.mubr.bf16.vlgmr.msra.gmra.mrb[44].mxu1 %v1940_v41  ;;  %vm236_vm14 = vcmp.ne.s32.totalorder %v235_v39, 0  ;;  %vm3447_vm8 = vcmp.ne.s32.totalorder %v242_v5, 0 }
 0x1fd   : > { %vm237_vm15 = vmand %vm233_vm13, %vm236_vm14 }
 0x1fe   : > { %vm3443_vm4 = vmand %vm237_vm15, %vm240_vm2 }
 0x1ff   : > { %vm244_vm9 = vmand %vm3443_vm4, %vm3447_vm8 }
 0x200   : > { %vm247_vm11 = vmand %vm244_vm9, %vm246_vm10 }
 0x2af   : > { %v2008_v27 = vpop.f32.mrb[36].mxu1 }
 0x2b0   : > { %v2009_v18 = vpop.f32.mrb[37].mxu1 }
 0x2b1   : > { %v2010_v40 = vadd.f32 %v2009_v18, %v2008_v27  ;;  %v2011_v13 = vpop.f32.mrb[38].mxu1 }
 0x2b2   : > { %v2012_v23 = vpop.f32.mrb[39].mxu1 }
 0x2b3   : > { %v2013_v36 = vadd.f32 %v2012_v23, %v2011_v13 }
 0x2b7   : > { %v2014_v60 = vpop.f32.mrb[40].mxu1 }
 0x2b8   : > { %v2015_v49 = vpop.f32.mrb[41].mxu1 }
 0x2b9   : > { %v2016_v2 = vadd.f32 %v2015_v49, %v2014_v60  ;;  %v2017_v3 = vpop.f32.mrb[42].mxu1 }
 0x2ba   : > { %v2018_v62 = vpop.f32.mrb[43].mxu1 }
 0x2bb   : > { %v2019_v31 = vadd.f32 %v2018_v62, %v2017_v3 }
 0x2cf   : > { %v2150_v32 = vpop.f32.mrb[44].mxu1 }
 0x2d0   : > { %v1698_v20 = vadd.f32 %v2150_v32, %v2016_v2  ;;  %v1689_v57 = vpop.f32.mrb[45].mxu1 }
 0x2d1   : > { %v1690_v45 = vadd.f32 %v2010_v40, %v1689_v57  ;;  %v2151_v53 = vpop.f32.mrb[46].mxu1 }
 0x2d2   : > { %v1736_v43 = vmul.f32 %v1732_v47, %v1698_v20  ;;  %v1757_v38 = vmul.f32 %v1752_v6, %v1698_v20  ;;  %v1701_v50 = vadd.f32 %v2151_v53, %v2019_v31  ;;  %v1692_v22 = vpop.f32.mrb[47].mxu1  ;;  %v3817_v47 = vld [vmem:[#allocation118_spill] sm:$0xff] }
 0x2d3   : > { %v1704_v25 = vmax.f32 %v1690_v45, 0.0  ;;  %v1713_v63 = vmul.f32 %v1708_v55, %v1690_v45  ;;  %v1693_v28 = vadd.f32 %v2013_v36, %v1692_v22 }
 0x2d4   : > { %v1740_v14 = vrot.slane %v1736_v43, 2  ;;  %v1758_v35 = vmul.f32 %v1754_v42, %v1701_v50  ;;  %v1761_v26 = vrot.slane %v1757_v38, 3  ;;  %v3818_v42 = vld [vmem:[#allocation117_spill] sm:$0xff]  ;;  %v3819_v50 = vld [vmem:[#allocation119_spill] sm:$0xff] }
 0x2d5   : > { %v1705_v34 = vsel %vm247_vm11, %v1704_v25, 0.0  ;;  %v1714_v0 = vmul.f32 %v1710_v54, %v1693_v28  ;;  %v1735_v59 = vmul.f32 %v1730_v8, %v1693_v28  ;;  %v1717_v24 = vrot.slane %v1713_v63, 1  ;;  %v3820_v25 = vld [vmem:[#allocation115_spill] sm:$0xff] }
 0x2d6   : > { %v1776_v1 = vsub.f32 0.0, %v1705_v34  ;;  %v1762_v29 = vrot.slane %v1758_v35, 3  ;;  %v1744_v16 = vsel %vm197_vm1, %v1740_v14, 0.0 }
 0x2d7   : > { %v1718_v37 = vrot.slane %v1714_v0, 1  ;;  %v1739_v48 = vrot.slane %v1735_v59, 2 }
 0x2d8   : > { %v1777_v52 = vmul.f32 %v1776_v1, %v3816_v19  ;;  %v1763_v30 = vsel %vm204_vm5, %v1761_v26, %v1762_v29  ;;  %v1766_v41 = vsel %vm197_vm1, %v1762_v29, 0.0  ;;  %v3821_v26 = vld [vmem:[#allocation116_spill] sm:$0xff] }
 0x2d9   : > { %v1767_v27 = vadd.f32 %v1766_v41, %v1763_v30  ;;  %v1719_v18 = vsel %vm208_vm7, %v1717_v24, %v1718_v37  ;;  %v1722_v40 = vsel %vm197_vm1, %v1718_v37, 0.0  ;;  %v1741_v13 = vsel %vm206_vm6, %v1739_v48, %v1740_v14 }
 0x2da   : > { %v1778_v23 = vmul.f32 1.442695, %v1777_v52  ;;  %v1723_v36 = vadd.f32 %v1722_v40, %v1719_v18  ;;  %v1745_v60 = vadd.f32 %v1744_v16, %v1741_v13 }
 0x2db   : > { %v1768_v49 = vrot.slane %v1767_v27, 4 }
 0x2dc   : > { %2204 = vpow2.f32 %v1778_v23  ;;  %v1724_v2 = vrot.slane %v1723_v36, 4  ;;  %v1746_v3 = vrot.slane %v1745_v60, 4 }
 0x2dd   : > { %v1769_v62 = vadd.f32 %v1768_v49, %v1767_v27 }
 0x2de   : > { %v1725_v31 = vadd.f32 %v1724_v2, %v1723_v36  ;;  %v1747_v46 = vadd.f32 %v1746_v3, %v1745_v60 }
 0x2df   : > { %v1770_v11 = vrot.slane %v1769_v62, 2 }
 0x2e0   : > { %v1726_v39 = vrot.slane %v1725_v31, 2  ;;  %v1748_v51 = vrot.slane %v1747_v46, 2 }
 0x2e1   : > { %v1771_v33 = vadd.f32 %v1770_v11, %v1769_v62 }
 0x2e2   : > { %v1727_v5 = vadd.f32 %v1726_v39, %v1725_v31  ;;  %v1749_v8 = vadd.f32 %v1748_v51, %v1747_v46 }
 0x2e3   : > { %v1772_v61 = vrot.slane %v1771_v33, 1 }
 0x2e4   : > { %v1728_v7 = vrot.slane %v1727_v5, 1  ;;  %v1750_v15 = vrot.slane %v1749_v8, 1 }
 0x2e5   : > { %v1773_v9 = vadd.f32 %v1772_v61, %v1771_v33 }
 0x2e6   : > { %v2205_v12 = vpop.eup %2204  ;;  %v1729_v6 = vadd.f32 %v1728_v7, %v1727_v5  ;;  %v1751_v58 = vadd.f32 %v1750_v15, %v1749_v8 }
 0x2e7   : > { %v1780_v55 = vsub.f32 1.0, %v2205_v12 }
 0x2e8   : > { %v1774_v32 = vsel %vm197_vm1, %v1729_v6, %v1751_v58 }
 0x2e9   : > { %v1781_v20 = vmul.f32 %v3817_v47, %v1780_v55  ;;  %v1793_v57 = vsub.f32 1.0, %v1780_v55  ;;  %v1775_v45 = vsel %vm199_vm3, %v1774_v32, %v1773_v9 }
 0x2eb   : > { %vm1782_vm12 = vcmp.gt.f32.partialorder %v1781_v20, 0.0001  ;;  %v1794_v53 = vmul.f32 %v3817_v47, %v1793_v57   ;;  %v1795_v43 = vadd.f32 %v3818_v42, %v1781_v20   ;;  %v1802_v22 = vmul.f32 %v1781_v20, %v3819_v50 }
 0x2ec   : > { %v1783_v38 = vsel %vm1782_vm12, 1, %v2247_v4  ;;  %v1799_v34 = vrot.slane %v1781_v20, %v2884_v44 }
 0x2ed   : > { %v1787_v54 = vrot.slane %v1783_v38, %v2884_v44  ;;  %v1803_v63 = vadd.f32 %v3820_v25, %v1802_v22   ;;  %v3824_v22 = vmov %v1795_v43  ;;  %v3825_v20 = vmov %v1794_v53 }
 0x2ee   :  { %v1804_v4 = vsub.f32 (%p217_p0), 1.0, %v1795_v43 }
 0x2ef   : > { %vm1788_vm13 = vcmp.eq.s32.totalorder %v1787_v54, 1  ;;  %v3822_v31 = vmov %v1803_v63  ;;  %v1813_v48 = vrot.slane (%p217_p0), %v1803_v63, 5 }
 0x2f0   : > { %v1789_v28 = vsel %vm1788_vm13, %v1775_v45, 0.0  ;;  %v1808_v29 = vrot.slane (%p217_p0), %v1804_v4, %v2884_v44 }
 0x2f1   : > { %v1790_v14 = vadd.f32 0.5, %v1789_v28 }
 0x2f3   : > { %v1791_v35 = vmax.f32 %v1790_v14, 0.0 }
 0x2f5   : > { %v1792_v0 = vmin.f32 %v1791_v35, 1.0  ;;  %219 = sbr.rel (!%p217_p0) target bundleno = 85 (0x55), region = 43 }
 0x2f7   : > { %v1800_v59 = vmul.f32 %v1799_v34, %v1792_v0 }
 0x2f9   : > { %v1801_v1 = vadd.f32 %v3821_v26, %v1800_v59  }
 0x2fb   : > { %v3823_v34 = vmov %v1801_v1  ;;  %v1809_v24 = vadd.f32 (%p217_p0), %v1808_v29, %v1801_v1 }
 0x2fd   :  { %v1810_v37 = vmax.f32 %v1809_v24, 0.0 }
 0x2ff   :  { %v1811_v16 = vmin.f32 %v1810_v37, 1.0 }
 0x301   :  { %v1815_v19 = vsel %vm132_vm0, %v1811_v16, %v1813_v48 }
 0x302   :  { %1816 = vst [vmem:[%s3497_s4] sm:$0xf] %v1815_v19 }

</bundles_post_ra>
